<compile_context>
chip_gen: v7x
topology: tpu7x:2x2x1
jax: 0.10.0
libtpu: 0.0.40
codegen_flags: <defaults>
</compile_context>

<pallas_src>
import jax
import jax.numpy as jnp
from jax.experimental import pallas as pl
from jax.experimental.pallas import tpu as pltpu


def graphcnn_kernel(h_ref, x_ref,
                    w_in_ref, b_in_ref,
                    w_hid_ref, b_hid_ref,
                    w_out_ref, b_out_ref,
                    out_ref):
    mdt = w_in_ref.dtype            # MXU operand dtype (bf16 or f32)
    Bt, N, E = h_ref.shape

    H = h_ref[...]                  # [Bt, N, E] f32 incidence matrices
    X = x_ref[...]                  # [Bt, N, F] mdt node features

    # ---- G = DV^{-1/2} * H * W * invDE * H^T * DV^{-1/2}, W = I -----------------
    # Degree / rsqrt / where math stays f32 (v5e has no bf16 VPU/EUP path).
    dv = jnp.sum(H, axis=2)                                  # node degrees [Bt, N]
    de = jnp.sum(H, axis=1)                                  # edge degrees [Bt, E]
    inv_de = jnp.where(de > 0.0, 1.0 / de, 0.0)              # inf -> 0
    inv_dv = jnp.where(dv > 0.0, jax.lax.rsqrt(dv), 0.0)     # inf -> 0
    A = (inv_dv[:, :, None] * H) * inv_de[:, None, :]        # DV2 * H * invDE

    # ... * H^T * DV2 — contract edge axes directly, no materialized transpose.
    G = jax.lax.dot_general(
        A.astype(mdt), H.astype(mdt),
        dimension_numbers=(((2,), (2,)), ((0,), (0,))),
        preferred_element_type=jnp.float32)                  # [Bt, N, N] f32
    G = G * inv_dv[:, None, :]
    Gm = G.astype(mdt)

    # ---- GCN stack: h = relu((G @ h) @ W + b), batched over the Bt graphs -------
    def layer(h_m, w_ref, b_ref):
        din = h_m.shape[-1]
        dout = w_ref.shape[-1]
        gh = jax.lax.dot_general(                            # [Bt, N, din] f32 acc
            Gm, h_m,
            dimension_numbers=(((2,), (1,)), ((0,), (0,))),
            preferred_element_type=jnp.float32)
        # Feature mixing as one big (Bt*N, din) @ (din, dout) MXU matmul.
        ghw = jnp.dot(gh.astype(mdt).reshape(Bt * N, din), w_ref[...],
                      preferred_element_type=jnp.float32)    # [Bt*N, dout] f32 acc
        out = ghw.reshape(Bt, N, dout) + b_ref[...]          # f32 bias add
        return jnp.maximum(out, 0.0)

    h = layer(X, w_in_ref, b_in_ref)                         # [Bt, N, hidden]
    h = layer(h.astype(mdt), w_hid_ref, b_hid_ref)           # [Bt, N, hidden]

    # ---- output layer fused with the node-axis sum (dim=-2):
    #   sum_n (G @ h @ W_out + b_out)[n] = (1^T G) h W_out + N * b_out
    g_sum = jnp.sum(G, axis=1)                               # column sums [Bt, N] f32
    pooled = jnp.sum(g_sum[:, :, None] * h, axis=1)          # [Bt, hidden] f32 (VPU)
    scores = jnp.dot(pooled.astype(mdt), w_out_ref[...],
                     preferred_element_type=jnp.float32)     # [Bt, C_pad] f32
    # Lane-dense (Bt, C_pad) unmasked store.
    out_ref[...] = scores + float(N) * b_out_ref[...]


def graphcnn_forward(H_batch, X_batch, params, *, block_b=8,
                     mxu_dtype=jnp.bfloat16):
    """H_batch: [B, N, E] f32, X_batch: [B, N, F] f32 -> scores [B, C] f32."""
    w_in, b_in, w_hid, b_hid, w_out, b_out = params
    B, N, E = H_batch.shape
    F_dim = X_batch.shape[-1]
    Hd = w_in.shape[1]
    C = w_out.shape[1]

    # Bt graphs per grid step; keep it a multiple of 8 (sublane tiling of the output)
    Bt = min(block_b, B)
    Bt = ((Bt + 7) // 8) * 8
    nb = pl.cdiv(B, Bt)
    B_pad = nb * Bt

    # Lane-dense output: zero-pad the output-layer width to a full 128-lane block.
    LANE = 128
    C_pad = ((C + LANE - 1) // LANE) * LANE

    # Pad batch with empty graphs (H = 0 -> G = 0); padded rows are sliced off below.
    if B_pad != B:
        H_batch = jnp.pad(H_batch, ((0, B_pad - B), (0, 0), (0, 0)))
        X_batch = jnp.pad(X_batch, ((0, B_pad - B), (0, 0), (0, 0)))

    # MXU operands in mxu_dtype (halves feature/weight DMA bytes when bf16);
    # biases stay f32 (added after f32 accumulation). H stays f32 (0/1, tiny).
    Xc = X_batch.astype(mxu_dtype)
    w_in_c = w_in.astype(mxu_dtype)
    w_hid_c = w_hid.astype(mxu_dtype)
    w_out_c = jnp.pad(w_out, ((0, 0), (0, C_pad - C))).astype(mxu_dtype)
    b_out_c = jnp.pad(b_out, ((0, 0), (0, C_pad - C)))

    def const_spec(shape):
        # weights / biases: one full-array block, identical for every grid step
        return pl.BlockSpec(shape, lambda b, n=len(shape): (0,) * n)

    # Advisory cost hint for XLA scheduling around the custom call.
    itemsz = Xc.dtype.itemsize
    flops = int(B_pad) * (
        2 * N * N * E                                   # G construction
        + 2 * N * N * (F_dim + Hd)                      # G @ h, layers 1-2
        + 2 * N * (F_dim * Hd + Hd * Hd)                # ... @ W, layers 1-2
        + 2 * N * Hd + 2 * Hd * C_pad)                  # pooled + output matmul
    bytes_accessed = int(
        B_pad * N * E * 4                               # H
        + B_pad * N * F_dim * itemsz                    # X
        + (F_dim * Hd + Hd * Hd + Hd * C_pad) * itemsz  # weights
        + (Hd + Hd + C_pad) * 4                         # biases
        + B_pad * C_pad * 4)                            # output

    out = pl.pallas_call(
        graphcnn_kernel,
        out_shape=jax.ShapeDtypeStruct((B_pad, C_pad), jnp.float32),
        grid_spec=pltpu.PrefetchScalarGridSpec(
            num_scalar_prefetch=0,
            grid=(nb,),
            in_specs=[
                pl.BlockSpec((Bt, N, E), lambda b: (b, 0, 0)),
                pl.BlockSpec((Bt, N, F_dim), lambda b: (b, 0, 0)),
                const_spec(w_in_c.shape), const_spec(b_in.shape),
                const_spec(w_hid_c.shape), const_spec(b_hid.shape),
                const_spec(w_out_c.shape), const_spec(b_out_c.shape),
            ],
            out_specs=pl.BlockSpec((Bt, C_pad), lambda b: (b, 0)),
        ),
        compiler_params=pltpu.CompilerParams(
            dimension_semantics=("parallel",)),   # megacore / dual-TC (v7x) sharding
        cost_estimate=pl.CostEstimate(
            flops=flops, transcendentals=int(B_pad * N),
            bytes_accessed=bytes_accessed),
    )(H_batch, Xc, w_in_c, b_in, w_hid_c, b_hid, w_out_c, b_out_c)

    return out[:B, :C]


def ref_forward(H_batch, X_batch, params):
    """Pure-JAX f32 reference for correctness checking."""
    w_in, b_in, w_hid, b_hid, w_out, b_out = params

    def one(H, X):
        dv = H.sum(1)
        de = H.sum(0)
        inv_de = jnp.where(de > 0.0, 1.0 / de, 0.0)
        inv_dv = jnp.where(dv > 0.0, dv ** -0.5, 0.0)
        G = ((inv_dv[:, None] * H) * inv_de[None, :]) @ H.T * inv_dv[None, :]
        h = jnp.maximum(G @ (X @ w_in) + b_in, 0.0)
        h = jnp.maximum(G @ (h @ w_hid) + b_hid, 0.0)
        h = G @ (h @ w_out) + b_out
        return h.sum(0)

    return jax.vmap(one)(H_batch, X_batch)


if __name__ == "__main__":
    # Small shapes consistent with the module: 16 graphs, N = 16 nodes,
    # E = 16 hyperedges, input_dim = 8, hidden_dim = 32, output_dim = 8.
    B, N, E = 16, 16, 16
    input_dim, hidden_dim, output_dim = 8, 32, 8

    key = jax.random.PRNGKey(0)
    k_h, k_x, k0, k1, k2 = jax.random.split(key, 5)

    # deterministic synthetic hypergraph incidence matrices (0/1) and features
    H_batch = (jax.random.uniform(k_h, (B, N, E)) > 0.5).astype(jnp.float32)
    X_batch = jax.random.normal(k_x, (B, N, input_dim), dtype=jnp.float32)

    # deterministic parameter init (synthetic; no checkpoint load)
    w_in = 0.1 * jax.random.normal(k0, (input_dim, hidden_dim), dtype=jnp.float32)
    b_in = jnp.zeros((1, hidden_dim), dtype=jnp.float32)
    w_hid = 0.1 * jax.random.normal(k1, (hidden_dim, hidden_dim), dtype=jnp.float32)
    b_hid = jnp.zeros((1, hidden_dim), dtype=jnp.float32)
    w_out = 0.1 * jax.random.normal(k2, (hidden_dim, output_dim), dtype=jnp.float32)
    b_out = jnp.zeros((1, output_dim), dtype=jnp.float32)
    params = (w_in, b_in, w_hid, b_hid, w_out, b_out)

    expected = jax.block_until_ready(
        ref_forward(H_batch, X_batch,
                    (w_in, b_in[0], w_hid, b_hid[0], w_out, b_out[0])))

    # exact path (f32 MXU operands) — tight check
    out_f32 = jax.block_until_ready(
        graphcnn_forward(H_batch, X_batch, params, block_b=8,
                         mxu_dtype=jnp.float32))
    assert out_f32.shape == (B, output_dim)
    assert jnp.allclose(out_f32, expected, atol=1e-4, rtol=1e-4), (out_f32, expected)

    # performance path (bf16 MXU operands, f32 accumulation) — looser check
    out_bf16 = jax.block_until_ready(
        graphcnn_forward(H_batch, X_batch, params, block_b=8,
                         mxu_dtype=jnp.bfloat16))
    assert out_bf16.shape == (B, output_dim)
    assert jnp.allclose(out_bf16, expected, atol=2e-1, rtol=1e-1), (out_bf16, expected)

    print("KERNEL_OK")
</pallas_src>

<mosaic_0001>
module attributes {stable_mosaic.version = 11 : i64} {
  func.func @graphcnn_kernel(%arg0: i32, %arg1: memref<8x16x16xf32, #tpu.memory_space<vmem>>, %arg2: memref<8x16x8xf32, #tpu.memory_space<vmem>>, %arg3: memref<8x32xf32, #tpu.memory_space<vmem>>, %arg4: memref<1x32xf32, #tpu.memory_space<vmem>>, %arg5: memref<32x32xf32, #tpu.memory_space<vmem>>, %arg6: memref<1x32xf32, #tpu.memory_space<vmem>>, %arg7: memref<32x128xf32, #tpu.memory_space<vmem>>, %arg8: memref<1x128xf32, #tpu.memory_space<vmem>>, %arg9: memref<8x128xf32, #tpu.memory_space<vmem>>) attributes {dimension_semantics = [#tpu.dimension_semantics<parallel>], iteration_bounds = array<i64: 2>, scalar_prefetch = 0 : i64, scratch_operands = 0 : i64, tpu.core_type = #tpu.core_type<tc>, window_params = [{transform_indices = @transform_0, window_bounds = array<i64: 8, 16, 16>}, {transform_indices = @transform_1, window_bounds = array<i64: 8, 16, 8>}, {pipeline_mode = #tpu.pipeline_mode<synchronous>, transform_indices = @transform_2, window_bounds = array<i64: 8, 32>}, {pipeline_mode = #tpu.pipeline_mode<synchronous>, transform_indices = @transform_3, window_bounds = array<i64: 1, 32>}, {pipeline_mode = #tpu.pipeline_mode<synchronous>, transform_indices = @transform_4, window_bounds = array<i64: 32, 32>}, {pipeline_mode = #tpu.pipeline_mode<synchronous>, transform_indices = @transform_5, window_bounds = array<i64: 1, 32>}, {pipeline_mode = #tpu.pipeline_mode<synchronous>, transform_indices = @transform_6, window_bounds = array<i64: 32, 128>}, {pipeline_mode = #tpu.pipeline_mode<synchronous>, transform_indices = @transform_7, window_bounds = array<i64: 1, 128>}, {transform_indices = @transform_8, window_bounds = array<i64: 8, 128>}]} {
    %c0 = arith.constant 0 : index
    %c0_0 = arith.constant 0 : index
    %c0_1 = arith.constant 0 : index
    %0 = vector.load %arg1[%c0, %c0_0, %c0_1] : memref<8x16x16xf32, #tpu.memory_space<vmem>>, vector<8x16x16xf32>
    %c0_2 = arith.constant 0 : index
    %c0_3 = arith.constant 0 : index
    %c0_4 = arith.constant 0 : index
    %1 = vector.load %arg2[%c0_2, %c0_3, %c0_4] : memref<8x16x8xf32, #tpu.memory_space<vmem>>, vector<8x16x8xf32>
    %cst = arith.constant dense<0.000000e+00> : vector<8x16xf32>
    %2 = vector.multi_reduction <add>, %0, %cst [2] : vector<8x16x16xf32> to vector<8x16xf32>
    %cst_5 = arith.constant dense<0.000000e+00> : vector<8x16xf32>
    %3 = vector.multi_reduction <add>, %0, %cst_5 [1] : vector<8x16x16xf32> to vector<8x16xf32>
    %cst_6 = arith.constant 0.000000e+00 : f32
    %4 = vector.broadcast %cst_6 : f32 to vector<8x16xf32>
    %5 = arith.cmpf ogt, %3, %4 : vector<8x16xf32>
    %cst_7 = arith.constant 1.000000e+00 : f32
    %6 = vector.broadcast %cst_7 : f32 to vector<8x16xf32>
    %7 = arith.divf %6, %3 : vector<8x16xf32>
    %cst_8 = arith.constant 0.000000e+00 : f32
    %8 = vector.broadcast %cst_8 : f32 to vector<8x16xf32>
    %9 = arith.select %5, %7, %8 : vector<8x16xi1>, vector<8x16xf32>
    %cst_9 = arith.constant 0.000000e+00 : f32
    %10 = vector.broadcast %cst_9 : f32 to vector<8x16xf32>
    %11 = arith.cmpf ogt, %2, %10 : vector<8x16xf32>
    %12 = math.rsqrt %2 : vector<8x16xf32>
    %cst_10 = arith.constant 0.000000e+00 : f32
    %13 = vector.broadcast %cst_10 : f32 to vector<8x16xf32>
    %14 = arith.select %11, %12, %13 : vector<8x16xi1>, vector<8x16xf32>
    %15 = vector.shape_cast %14 : vector<8x16xf32> to vector<8x16x1xf32>
    %16 = vector.broadcast %15 : vector<8x16x1xf32> to vector<8x16x16xf32>
    %17 = arith.mulf %16, %0 : vector<8x16x16xf32>
    %18 = vector.shape_cast %9 : vector<8x16xf32> to vector<8x1x16xf32>
    %19 = vector.broadcast %18 : vector<8x1x16xf32> to vector<8x16x16xf32>
    %20 = arith.mulf %17, %19 : vector<8x16x16xf32>
    %cst_11 = arith.constant dense<0.000000e+00> : vector<8x16x16xf32>
    %21 = tpu.matmul %20, %0, %cst_11 {dimension_numbers = #tpu.dot_dimension_numbers<[2], [2], [1], [1], [0, 0, 0, 1, 1, 1], [0], [0]>} : vector<8x16x16xf32>, vector<8x16x16xf32>, vector<8x16x16xf32> -> vector<8x16x16xf32>
    %22 = vector.shape_cast %14 : vector<8x16xf32> to vector<8x1x16xf32>
    %23 = vector.broadcast %22 : vector<8x1x16xf32> to vector<8x16x16xf32>
    %24 = arith.mulf %21, %23 : vector<8x16x16xf32>
    %cst_12 = arith.constant dense<0.000000e+00> : vector<8x16x8xf32>
    %25 = tpu.matmul %24, %1, %cst_12 {dimension_numbers = #tpu.dot_dimension_numbers<[2], [1], [1], [2], [0, 0, 0, 1, 1, 2], [0], [0]>} : vector<8x16x16xf32>, vector<8x16x8xf32>, vector<8x16x8xf32> -> vector<8x16x8xf32>
    %26 = vector.shape_cast %25 : vector<8x16x8xf32> to vector<128x8xf32>
    %c0_13 = arith.constant 0 : index
    %c0_14 = arith.constant 0 : index
    %27 = vector.load %arg3[%c0_13, %c0_14] : memref<8x32xf32, #tpu.memory_space<vmem>>, vector<8x32xf32>
    %cst_15 = arith.constant dense<0.000000e+00> : vector<128x32xf32>
    %28 = tpu.matmul %26, %27, %cst_15 {dimension_numbers = #tpu.dot_dimension_numbers<[1], [0], [0], [1], [0, 0, 1, 1], [], []>} : vector<128x8xf32>, vector<8x32xf32>, vector<128x32xf32> -> vector<128x32xf32>
    %29 = vector.shape_cast %28 : vector<128x32xf32> to vector<8x16x32xf32>
    %c0_16 = arith.constant 0 : index
    %c0_17 = arith.constant 0 : index
    %30 = vector.load %arg4[%c0_16, %c0_17] : memref<1x32xf32, #tpu.memory_space<vmem>>, vector<1x32xf32>
    %31 = vector.shape_cast %30 : vector<1x32xf32> to vector<1x1x32xf32>
    %32 = vector.broadcast %31 : vector<1x1x32xf32> to vector<8x16x32xf32>
    %33 = arith.addf %29, %32 : vector<8x16x32xf32>
    %cst_18 = arith.constant 0.000000e+00 : f32
    %34 = vector.broadcast %cst_18 : f32 to vector<8x16x32xf32>
    %35 = arith.maximumf %33, %34 : vector<8x16x32xf32>
    %cst_19 = arith.constant dense<0.000000e+00> : vector<8x16x32xf32>
    %36 = tpu.matmul %24, %35, %cst_19 {dimension_numbers = #tpu.dot_dimension_numbers<[2], [1], [1], [2], [0, 0, 0, 1, 1, 2], [0], [0]>} : vector<8x16x16xf32>, vector<8x16x32xf32>, vector<8x16x32xf32> -> vector<8x16x32xf32>
    %37 = vector.shape_cast %36 : vector<8x16x32xf32> to vector<128x32xf32>
    %c0_20 = arith.constant 0 : index
    %c0_21 = arith.constant 0 : index
    %38 = vector.load %arg5[%c0_20, %c0_21] : memref<32x32xf32, #tpu.memory_space<vmem>>, vector<32x32xf32>
    %cst_22 = arith.constant dense<0.000000e+00> : vector<128x32xf32>
    %39 = tpu.matmul %37, %38, %cst_22 {dimension_numbers = #tpu.dot_dimension_numbers<[1], [0], [0], [1], [0, 0, 1, 1], [], []>} : vector<128x32xf32>, vector<32x32xf32>, vector<128x32xf32> -> vector<128x32xf32>
    %40 = vector.shape_cast %39 : vector<128x32xf32> to vector<8x16x32xf32>
    %c0_23 = arith.constant 0 : index
    %c0_24 = arith.constant 0 : index
    %41 = vector.load %arg6[%c0_23, %c0_24] : memref<1x32xf32, #tpu.memory_space<vmem>>, vector<1x32xf32>
    %42 = vector.shape_cast %41 : vector<1x32xf32> to vector<1x1x32xf32>
    %43 = vector.broadcast %42 : vector<1x1x32xf32> to vector<8x16x32xf32>
    %44 = arith.addf %40, %43 : vector<8x16x32xf32>
    %cst_25 = arith.constant 0.000000e+00 : f32
    %45 = vector.broadcast %cst_25 : f32 to vector<8x16x32xf32>
    %46 = arith.maximumf %44, %45 : vector<8x16x32xf32>
    %cst_26 = arith.constant dense<0.000000e+00> : vector<8x16xf32>
    %47 = vector.multi_reduction <add>, %24, %cst_26 [1] : vector<8x16x16xf32> to vector<8x16xf32>
    %48 = vector.shape_cast %47 : vector<8x16xf32> to vector<8x16x1xf32>
    %49 = vector.broadcast %48 : vector<8x16x1xf32> to vector<8x16x32xf32>
    %50 = arith.mulf %49, %46 : vector<8x16x32xf32>
    %cst_27 = arith.constant dense<0.000000e+00> : vector<8x32xf32>
    %51 = vector.multi_reduction <add>, %50, %cst_27 [1] : vector<8x16x32xf32> to vector<8x32xf32>
    %c0_28 = arith.constant 0 : index
    %c0_29 = arith.constant 0 : index
    %52 = vector.load %arg7[%c0_28, %c0_29] : memref<32x128xf32, #tpu.memory_space<vmem>>, vector<32x128xf32>
    %cst_30 = arith.constant dense<0.000000e+00> : vector<8x128xf32>
    %53 = tpu.matmul %51, %52, %cst_30 {dimension_numbers = #tpu.dot_dimension_numbers<[1], [0], [0], [1], [0, 0, 1, 1], [], []>} : vector<8x32xf32>, vector<32x128xf32>, vector<8x128xf32> -> vector<8x128xf32>
    %c0_31 = arith.constant 0 : index
    %c0_32 = arith.constant 0 : index
    %54 = vector.load %arg8[%c0_31, %c0_32] : memref<1x128xf32, #tpu.memory_space<vmem>>, vector<1x128xf32>
    %cst_33 = arith.constant 1.600000e+01 : f32
    %55 = vector.broadcast %cst_33 : f32 to vector<1x128xf32>
    %56 = arith.mulf %55, %54 : vector<1x128xf32>
    %57 = vector.broadcast %56 : vector<1x128xf32> to vector<8x128xf32>
    %58 = arith.addf %53, %57 : vector<8x128xf32>
    %c0_34 = arith.constant 0 : index
    %c0_35 = arith.constant 0 : index
    %59 = vector.load %arg9[%c0_34, %c0_35] : memref<8x128xf32, #tpu.memory_space<vmem>>, vector<8x128xf32>
    tpu.vector_store %arg9[%c0_34, %c0_35], %58 {strides = array<i32>} : memref<8x128xf32, #tpu.memory_space<vmem>>, vector<8x128xf32>,
    return
  }
  func.func @transform_0(%arg0: i32) -> (i32, i32, i32) {
    %c0_i32 = arith.constant 0 : i32
    %c0_i32_0 = arith.constant 0 : i32
    %c0_i32_1 = arith.constant 0 : i32
    return %arg0, %c0_i32, %c0_i32_0 : i32, i32, i32
  }
  func.func @transform_1(%arg0: i32) -> (i32, i32, i32) {
    %c0_i32 = arith.constant 0 : i32
    %c0_i32_0 = arith.constant 0 : i32
    %c0_i32_1 = arith.constant 0 : i32
    return %arg0, %c0_i32, %c0_i32_0 : i32, i32, i32
  }
  func.func @transform_2(%arg0: i32) -> (i32, i32) {
    %c0_i32 = arith.constant 0 : i32
    %c0_i32_0 = arith.constant 0 : i32
    %c0_i32_1 = arith.constant 0 : i32
    return %c0_i32, %c0_i32_0 : i32, i32
  }
  func.func @transform_3(%arg0: i32) -> (i32, i32) {
    %c0_i32 = arith.constant 0 : i32
    %c0_i32_0 = arith.constant 0 : i32
    %c0_i32_1 = arith.constant 0 : i32
    return %c0_i32, %c0_i32_0 : i32, i32
  }
  func.func @transform_4(%arg0: i32) -> (i32, i32) {
    %c0_i32 = arith.constant 0 : i32
    %c0_i32_0 = arith.constant 0 : i32
    %c0_i32_1 = arith.constant 0 : i32
    return %c0_i32, %c0_i32_0 : i32, i32
  }
  func.func @transform_5(%arg0: i32) -> (i32, i32) {
    %c0_i32 = arith.constant 0 : i32
    %c0_i32_0 = arith.constant 0 : i32
    %c0_i32_1 = arith.constant 0 : i32
    return %c0_i32, %c0_i32_0 : i32, i32
  }
  func.func @transform_6(%arg0: i32) -> (i32, i32) {
    %c0_i32 = arith.constant 0 : i32
    %c0_i32_0 = arith.constant 0 : i32
    %c0_i32_1 = arith.constant 0 : i32
    return %c0_i32, %c0_i32_0 : i32, i32
  }
  func.func @transform_7(%arg0: i32) -> (i32, i32) {
    %c0_i32 = arith.constant 0 : i32
    %c0_i32_0 = arith.constant 0 : i32
    %c0_i32_1 = arith.constant 0 : i32
    return %c0_i32, %c0_i32_0 : i32, i32
  }
  func.func @transform_8(%arg0: i32) -> (i32, i32) {
    %c0_i32 = arith.constant 0 : i32
    %c0_i32_0 = arith.constant 0 : i32
    return %arg0, %c0_i32 : i32, i32
  }
}

</mosaic_0001>

<bundles_post_ra>
// kernel: tpu_custom_call.1
= control target key start
LH: loop header
LB: loop body
LE: loop exit
PB: predicated region body
PF: predicated region fallthrough
CT: control target
= control target key end

     0   :  { %13 = vsyncpa [#allocation3], 0  ;;  %s5118_s0 = inlined_call_operand.vmem [shape: f32[16,16,16], index: 0, kind: input, shape index: {}]   ;;  %s5119_s1 = inlined_call_operand.vmem [shape: f32[16,16,8], index: 1, kind: input, shape index: {}]   ;;  %s5120_s2 = inlined_call_operand.vmem [shape: f32[8,32], index: 2, kind: input, shape index: {}]   ;;  %s5121_s3 = inlined_call_operand.vmem [shape: f32[1,32], index: 3, kind: input, shape index: {}]   ;;  %s5122_s4 = inlined_call_operand.vmem [shape: f32[32,32], index: 4, kind: input, shape index: {}]   ;;  %s5123_s5 = inlined_call_operand.vmem [shape: f32[1,32], index: 5, kind: input, shape index: {}]   ;;  %s5124_s6 = inlined_call_operand.vmem [shape: f32[32,128], index: 6, kind: input, shape index: {}]   ;;  %s5125_s7 = inlined_call_operand.vmem [shape: f32[1,128], index: 7, kind: input, shape index: {}]   ;;  %s5126_s8 = inlined_call_operand.hbm [shape: f32[16,128], index: 8, kind: output, shape index: {}]  }
   0x1   :  { %15 = vsyncpa [#allocation3 + $0x1], 0  ;;  %s4392_s27 = smov 0   ;;  %s4394_s28 = smov 0  }
   0x2   :  { %s4396_s29 = smov 0   ;;  %s4398_s30 = smov 0  }
   0x3 LB: > { %s4413_s9 = sadd.s32 4294967295, %s4341_s30   ;;  %s3570_s10 = sadd.s32 4294967294, %s4341_s30   ;;  %s4341_s30 = sphi %s4398_s30, %s5134_s30   ;;  %s4337_s29 = sphi %s4396_s29, %s5133_s29   ;;  %s4333_s28 = sphi %s4394_s28, %s5132_s28   ;;  %s4329_s27 = sphi %s4392_s27, %s5131_s27  }
   0x4   : > { %s4417_s11 = sadd.s32 1, %s4341_s30   ;;  %s206_s12 = sadd.s32 1, %s4337_s29 }
   0x5   : > { %s203_s13 = ssub.s32 %s4341_s30, %s4417_s11  ;;  %p216_p0 = scmp.ne.s32.totalorder %s4337_s29, %s4333_s28 }
   0x6   : > { %p204_p1 = scmp.eq.s32.totalorder %s203_s13, 0  ;;  %p217_p2 = scmp.eq.s32.totalorder %s4413_s9, 1 }
   0x7   : > { %p222_p3 = scmp.ne.s32.totalorder %s4333_s28, %s4329_s27  ;;  %p223_p4 = scmp.eq.s32.totalorder %s3570_s10, 1 }
   0x8   : > { %s4428_s14 = scalar_select %p204_p1, %s4337_s29, %s206_s12  }
   0x9   : > { %p4430_p5 = por %p217_p2, %p216_p0  ;;  %p4434_p6 = por %p223_p4, %p222_p3 }
   0xa   : > { %p3573_p7 = scmp.ge.s32.totalorder %s4341_s30, 1  ;;  %p279_p8 = scmp.lt.s32.totalorder %s4341_s30, 3 }
   0xc   : > { %p280_p9 = pnand %p3573_p7, %p279_p8 }
   0xd   : > { %s3575_s17 = sshll.u32 (!%p280_p9), %s4413_s9, 3  ;;  %vm366_vm0 = vcmask (!%p280_p9), 130048   ;;  %vm1306_vm9 = vcmask (!%p280_p9), 130112   ;;  %s3681_s25 = sshll.u32 (!%p280_p9), %s4413_s9, 7 }
   0xe   : > { %283 = sbr.rel (%p280_p9) target bundleno = 1547 (0x60b), region = 52  ;;  %p321_p10 = scmp.lt.s32.totalorder (!%p280_p9), %s3575_s17, 15  ;;  %vm4539_vm1 = vmpackc.low (!%p280_p9), %vm366_vm0, %vm366_vm0 }
   0xf   : > { %s4346_s9 = smov (!%p280_p9), [#allocation2]  }
  0x10   : > { %s4283_s20 = sshll.u32 (!%p280_p9), %s4346_s9, 4  ;;  %s4284_s20 = int_to_ptr.vmem [resolvable:$false] %s4283_s20 }
  0x11   : > { %s4285_s22 = scalar_lea.vmem (!%p280_p9), %s4284_s20, 256 }
  0x15   : > { %s5136_s17 = smov (!%p321_p10, %s3575_s17), 15 }
  0x16   : > { %s3684_s18 = sshll.u32 %s5136_s17, 4  ;;  %s5076_s17 = scalar_lea.hbm %s5126_s8, %s3681_s25 }
  0x17   : > { %s4449_s21 = scalar_lea.vmem %s5118_s0, %s3684_s18  ;;  %s4784_s24 = scalar_lea.vmem %s5119_s1, %s3684_s18 }
  0x18   : > { %v4452_v0 = vld [vmem:[%s4449_s21 + $0x10] sm:$0xff]  ;;  %v4455_v1 = vld [vmem:[%s4449_s21] sm:$0xff]  ;;  %v4458_v2 = vld [vmem:[%s4449_s21 + $0x18] sm:$0xff] }
  0x19   : > { %v373_v3 = vsel %vm366_vm0, %v4452_v0, 0.0  ;;  %v367_v4 = vsel %vm366_vm0, %v4455_v1, 0.0  ;;  %v376_v5 = vsel %vm366_vm0, %v4458_v2, 0.0  ;;  %v4467_v6 = vld [vmem:[%s4449_s21 + $0x8] sm:$0xff]  ;;  %v4470_v7 = vld [vmem:[%s4449_s21 + $0x20] sm:$0xff]  ;;  %v4482_v13 = vld [vmem:[%s4449_s21 + $0x30] sm:$0xff]  ;;  %v4067_v43 = vpack.c.bf16 %v4458_v2, %v4452_v0 }
  0x1a   : > { %v4473_v8 = vld [vmem:[%s4449_s21 + $0x28] sm:$0xff]  ;;  %374 = vadd.xlane.f32.xlu1 %v373_v3  ;;  %368 = vadd.xlane.f32.xlu0 %v367_v4  ;;  %v422_v9 = vadd.f32 %v376_v5, %v373_v3  ;;  %v370_v10 = vsel %vm366_vm0, %v4467_v6, 0.0  ;;  %v379_v11 = vsel %vm366_vm0, %v4470_v7, 0.0  ;;  %v4485_v14 = vld [vmem:[%s4449_s21 + $0x38] sm:$0xff]  ;;  %v4488_v15 = vld [vmem:[%s4449_s21 + $0x40] sm:$0xff]  ;;  %v385_v19 = vsel %vm366_vm0, %v4482_v13, 0.0 }
  0x1b   : > { %v382_v12 = vsel %vm366_vm0, %v4473_v8, 0.0  ;;  %v415_v16 = vadd.f32 %v370_v10, %v367_v4  ;;  %v4491_v18 = vld [vmem:[%s4449_s21 + $0x48] sm:$0xff]  ;;  %v388_v20 = vsel %vm366_vm0, %v4485_v14, 0.0  ;;  %v4498_v21 = vld [vmem:[%s4449_s21 + $0x50] sm:$0xff]  ;;  %v4501_v22 = vld [vmem:[%s4449_s21 + $0x58] sm:$0xff]  ;;  %v391_v24 = vsel %vm366_vm0, %v4488_v15, 0.0  ;;  %4069 = vmatprep.subr.msk.bf16.mxu1 %vm4539_vm1, %v4067_v43 }
  0x1c   : > { %v429_v17 = vadd.f32 %v382_v12, %v379_v11  ;;  %v436_v23 = vadd.f32 %v388_v20, %v385_v19  ;;  %v394_v25 = vsel %vm366_vm0, %v4491_v18, 0.0  ;;  %v397_v27 = vsel %vm366_vm0, %v4498_v21, 0.0  ;;  %v4512_v29 = vld [vmem:[%s4449_s21 + $0x60] sm:$0xff]  ;;  %v4515_v30 = vld [vmem:[%s4449_s21 + $0x68] sm:$0xff]  ;;  %v4522_v34 = vld [vmem:[%s4449_s21 + $0x70] sm:$0xff]  ;;  %4072 = vmatpush3.bf16.xpose.msk.msra.mxu1 %vm4539_vm1, %v4067_v43 }
  0x1d   : > { %v443_v26 = vadd.f32 %v394_v25, %v391_v24  ;;  %v400_v28 = vsel %vm366_vm0, %v4501_v22, 0.0  ;;  %v403_v32 = vsel %vm366_vm0, %v4512_v29, 0.0  ;;  %v406_v33 = vsel %vm366_vm0, %v4515_v30, 0.0  ;;  %v4525_v35 = vld [vmem:[%s4449_s21 + $0x78] sm:$0xff]  ;;  %s317_s21 = sand.u32 1, %s4333_s28  }
  0x1e   : > { %377 = vadd.xlane.f32.xlu1 %v376_v5  ;;  %371 = vadd.xlane.f32.xlu0 %v370_v10  ;;  %v450_v31 = vadd.f32 %v400_v28, %v397_v27  ;;  %v457_v36 = vadd.f32 %v406_v33, %v403_v32  ;;  %v409_v37 = vsel %vm366_vm0, %v4522_v34, 0.0  ;;  %v412_v38 = vsel %vm366_vm0, %v4525_v35, 0.0  ;;  %s3486_s18 = scalar_lea.sflag [#allocation3], %s317_s21 }
  0x1f   : > { %v464_v39 = vadd.f32 %v412_v38, %v409_v37  ;;  %v4061_v40 = vpack.c.bf16 %v4467_v6, %v4455_v1  ;;  %v4535_v41 = vpack.c.bf16 %v4473_v8, %v4470_v7  ;;  %v4547_v44 = vpack.c.bf16 %v4485_v14, %v4482_v13 }
  0x20   : > { %v430_v45 = vrot.slane %v429_v17, 4  ;;  %v416_v46 = vrot.slane %v415_v16, 4  ;;  %v423_v47 = vrot.slane %v422_v9, 4  ;;  %v437_v53 = vrot.slane %v436_v23, 4 }
  0x21   : > { %4063 = vmatprep.subr.msk.bf16.mxu0 %vm4539_vm1, %v4061_v40  ;;  %4081 = vmatprep.subr.msk.bf16.mxu1 %vm4539_vm1, %v4547_v44  ;;  %v444_v55 = vrot.slane %v443_v26, 4  ;;  %v451_v59 = vrot.slane %v450_v31, 4  ;;  %v458_v62 = vrot.slane %v457_v36, 4 }
  0x22   : > { %380 = vadd.xlane.f32.xlu0 %v379_v11  ;;  %383 = vadd.xlane.f32.xlu1 %v382_v12  ;;  %v431_v48 = vadd.f32 %v430_v45, %v429_v17  ;;  %v417_v49 = vadd.f32 %v416_v46, %v415_v16  ;;  %v424_v50 = vadd.f32 %v423_v47, %v422_v9 }
  0x23   : > { %4066 = vmatpush3.bf16.xpose.msk.msra.mxu0 %vm4539_vm1, %v4061_v40  ;;  %v438_v58 = vadd.f32 %v437_v53, %v436_v23  ;;  %v445_v61 = vadd.f32 %v444_v55, %v443_v26  ;;  %v452_v4 = vadd.f32 %v451_v59, %v450_v31  ;;  %v459_v11 = vadd.f32 %v458_v62, %v457_v36 }
  0x24   : > { %4075 = vmatprep.subr.msk.bf16.mxu0 %vm4539_vm1, %v4535_v41  ;;  %v432_v51 = vrot.slane %v431_v48, 2  ;;  %v418_v52 = vrot.slane %v417_v49, 2  ;;  %v425_v54 = vrot.slane %v424_v50, 2 }
  0x25   : > { %v439_v3 = vrot.slane %v438_v58, 2  ;;  %v446_v10 = vrot.slane %v445_v61, 2  ;;  %v453_v17 = vrot.slane %v452_v4, 2 }
  0x26   : > { %386 = vadd.xlane.f32.xlu0 %v385_v19  ;;  %389 = vadd.xlane.f32.xlu1 %v388_v20  ;;  %v433_v56 = vadd.f32 %v432_v51, %v431_v48  ;;  %v419_v57 = vadd.f32 %v418_v52, %v417_v49  ;;  %v426_v60 = vadd.f32 %v425_v54, %v424_v50 }
  0x27   : > { %v440_v16 = vadd.f32 %v439_v3, %v438_v58  ;;  %v447_v20 = vadd.f32 %v446_v10, %v445_v61  ;;  %v4591_v61 = vpack.c.bf16 %v4501_v22, %v4498_v21 }
  0x28   : > { %v434_v63 = vrot.slane %v433_v56, 1  ;;  %v420_v5 = vrot.slane %v419_v57, 1  ;;  %v427_v12 = vrot.slane %v426_v60, 1 }
  0x29   : > { %v441_v26 = vrot.slane %v440_v16, 1 }
  0x2a   : > { %392 = vadd.xlane.f32.xlu0 %v391_v24  ;;  %395 = vadd.xlane.f32.xlu1 %v394_v25  ;;  %v4563_v9 = vadd.f32 %v434_v63, %v433_v56  ;;  %v421_v19 = vadd.f32 %v420_v5, %v419_v57  ;;  %v460_v24 = vrot.slane %v459_v11, 2  ;;  %v465_v25 = vrot.slane %v464_v39, 4 }
  0x2b   : > { %v428_v23 = vadd.f32 %v427_v12, %v426_v60  ;;  %v4587_v60 = vpack.c.bf16 %v4491_v18, %v4488_v15 }
  0x2c   : > { %4231 = vrcp.f32 %v4563_v9  ;;  %v461_v31 = vadd.f32 %v460_v24, %v459_v11  ;;  %vm471_vm2 = vcmp.gt.f32.partialorder %v421_v19, 0.0  ;;  %vm473_vm4 = vcmp.gt.f32.partialorder %v4563_v9, 0.0 }
  0x2d   : > { %4233 = vrcp.f32 %v421_v19  ;;  %vm472_vm5 = vcmp.gt.f32.partialorder %v428_v23, 0.0 }
  0x2e   : > { %398 = vadd.xlane.f32.xlu0 %v397_v27  ;;  %401 = vadd.xlane.f32.xlu1 %v400_v28  ;;  %v454_v27 = vadd.f32 %v453_v17, %v452_v4  ;;  %v448_v28 = vrot.slane %v447_v20, 1  ;;  %4235 = vrcp.f32 %v428_v23  ;;  %v462_v45 = vrot.slane %v461_v31, 1 }
  0x30   : > { %v455_v40 = vrot.slane %v454_v27, 1  ;;  %v4568_v43 = vadd.f32 %v448_v28, %v447_v20  ;;  %v4576_v52 = vadd.f32 %v462_v45, %v461_v31 }
  0x32   : > { %404 = vadd.xlane.f32.xlu0 %v403_v32  ;;  %407 = vadd.xlane.f32.xlu1 %v406_v33  ;;  %v466_v32 = vadd.f32 %v465_v25, %v464_v39  ;;  %v4573_v39 = vadd.f32 %v455_v40, %v454_v27  ;;  %vm475_vm14 = vcmp.gt.f32.partialorder %v4568_v43, 0.0 }
  0x34   : > { %v467_v46 = vrot.slane %v466_v32, 2 }
  0x36   : > { %410 = vadd.xlane.f32.xlu0 %v409_v37  ;;  %413 = vadd.xlane.f32.xlu1 %v412_v38  ;;  %v1295_v37 = vlaneseq  ;;  %v4566_v38 = vadd.f32 %v441_v26, %v440_v16  ;;  %v4232_v51 = vpop.eup %4231  ;;  %v4578_v53 = vadd.f32 %v467_v46, %v466_v32 }
  0x37   : > { %v4234_v56 = vpop.eup %4233  ;;  %v4607_v16 = vsel %vm473_vm4, %v4232_v51, 0.0  ;;  %vm476_vm4 = vcmp.gt.f32.partialorder %v4573_v39, 0.0 }
  0x38   : > { %v1296_v49 = vand.u32 127, %v1295_v37  ;;  %v4570_v50 = vshrl.u32 %v1295_v37, 7  ;;  %v4236_v59 = vpop.eup %4235  ;;  %v469_v3 = vrot.slane %v4578_v53, 1  ;;  %v495_v9 = vsel %vm471_vm2, %v4234_v56, 0.0 }
  0x39   : > { %v496_v20 = vsel %vm472_vm5, %v4236_v59, 0.0  ;;  %vm474_vm8 = vcmp.gt.f32.partialorder %v4566_v38, 0.0 }
  0x3a   : > { %v4583_v57 = vsub.s32 %v1296_v49, %v4570_v50  ;;  %v1301_v58 = vadd.s32 4294967288, %v1296_v49 }
  0x3c   : > { %v4603_v12 = vsub.s32 %v1301_v58, %v4570_v50 }
  0xa7   : > { %v375_v33 = vpop.xlane.xlu1 %374  ;;  %v369_v36 = vpop.xlane.xlu0 %368 }
  0xa8   : > { %4237 = vrsqrt.f32 %v375_v33  ;;  %vm505_vm3 = vcmp.gt.f32.partialorder %v375_v33, 0.0  ;;  %vm503_vm6 = vcmp.gt.f32.partialorder %v369_v36, 0.0 }
  0xa9   : > { %4239 = vrsqrt.f32 %v369_v36 }
  0xab   : > { %v378_v47 = vpop.xlane.xlu1 %377  ;;  %v372_v48 = vpop.xlane.xlu0 %371 }
  0xac   : > { %4241 = vrsqrt.f32 %v378_v47  ;;  %vm506_vm7 = vcmp.gt.f32.partialorder %v378_v47, 0.0  ;;  %vm504_vm10 = vcmp.gt.f32.partialorder %v372_v48, 0.0 }
  0xad   : > { %4243 = vrsqrt.f32 %v372_v48 }
  0xae   : > { %4245 = vrcp.f32 %v4566_v38 }
  0xaf   : > { %4247 = vrcp.f32 %v4568_v43  ;;  %v381_v54 = vpop.xlane.xlu0 %380  ;;  %v4580_v55 = vpop.xlane.xlu1 %383 }
  0xb0   : > { %4249 = vrsqrt.f32 %v381_v54  ;;  %vm507_vm11 = vcmp.gt.f32.partialorder %v381_v54, 0.0  ;;  %vm508_vm12 = vcmp.gt.f32.partialorder %v4580_v55, 0.0 }
  0xb1   : > { %4251 = vrsqrt.f32 %v4580_v55 }
  0xb2   : > { %v4238_v62 = vpop.eup %4237  ;;  %4253 = vrcp.f32 %v4573_v39 }
  0xb3   : > { %v4240_v63 = vpop.eup %4239  ;;  %4255 = vrcp.f32 %v4576_v52  ;;  %v537_v4 = vsel %vm505_vm3, %v4238_v62, 0.0  ;;  %v4598_v5 = vpop.xlane.xlu0 %386 }
  0xb4   : > { %v4600_v10 = vpop.xlane.xlu1 %389  ;;  %v535_v11 = vsel %vm503_vm6, %v4240_v63, 0.0  ;;  %4257 = vrsqrt.f32 %v4598_v5  ;;  %v553_v25 = vmul.f32 %v537_v4, %v4452_v0  ;;  %v4641_v63 = vadd.f32 %v469_v3, %v4578_v53 }
  0xb5   : > { %4259 = vrsqrt.f32 %v4600_v10  ;;  %v551_v17 = vmul.f32 %v535_v11, %v4455_v1  ;;  %v1311_v1 = vrot.slane %v537_v4, %v4583_v57  ;;  %v1300_v0 = vrot.slane %v535_v11, %v4583_v57 }
  0xb6   : > { %v4242_v24 = vpop.eup %4241  ;;  %v569_v47 = vmul.f32 %v553_v25, %v496_v20  ;;  %vm509_vm13 = vcmp.gt.f32.partialorder %v4598_v5, 0.0  ;;  %vm510_vm15 = vcmp.gt.f32.partialorder %v4600_v10, 0.0  ;;  %v4685_v25 = vpack.c.bf16 %v4515_v30, %v4512_v29 }
  0xb7   : > { %v4244_v23 = vpop.eup %4243  ;;  %v538_v26 = vsel %vm506_vm7, %v4242_v24, 0.0  ;;  %v4613_v19 = vpop.xlane.xlu0 %392  ;;  %v567_v28 = vmul.f32 %v551_v17, %v495_v9  ;;  %vm477_vm6 = vcmp.gt.f32.partialorder %v4576_v52, 0.0 }
  0xb8   : > { %v4615_v27 = vpop.xlane.xlu1 %395  ;;  %v4246_v31 = vpop.eup %4245  ;;  %v554_v32 = vmul.f32 %v538_v26, %v4458_v2  ;;  %v1315_v33 = vrot.slane %v538_v26, %v4603_v12  ;;  %v536_v36 = vsel %vm504_vm10, %v4244_v23, 0.0  ;;  %4261 = vrsqrt.f32 %v4613_v19  ;;  %3835 = vmatprep.mubr.msk.f32.mxu1 %vm366_vm0, %v569_v47 }
  0xb9   : > { %v4248_v37 = vpop.eup %4247  ;;  %v552_v40 = vmul.f32 %v536_v36, %v4467_v6  ;;  %v1305_v45 = vrot.slane %v536_v36, %v4603_v12  ;;  %3828 = vmatprep.mubr.msk.f32.mxu0 %vm366_vm0, %v567_v28  ;;  %4263 = vrsqrt.f32 %v4615_v27  ;;  %v498_v17 = vsel %vm474_vm8, %v4246_v31, 0.0 }
  0xba   : > { %v4250_v46 = vpop.eup %4249  ;;  %v570_v48 = vmul.f32 %v554_v32, %v496_v20  ;;  %v4627_v2 = vsel %vm1306_vm9, %v1315_v33, %v1311_v1  ;;  %v4692_v28 = vpack.c.bf16 %v4525_v35, %v4522_v34  ;;  %v499_v31 = vsel %vm475_vm14, %v4248_v37, 0.0 }
  0xbb   : > { %v4252_v49 = vpop.eup %4251  ;;  %v539_v51 = vsel %vm507_vm11, %v4250_v46, 0.0  ;;  %v568_v6 = vmul.f32 %v552_v40, %v495_v9  ;;  %v4631_v56 = vpop.xlane.xlu0 %398  ;;  %v4636_v59 = vsel %vm1306_vm9, %v1305_v45, %v1300_v0  ;;  %vm511_vm2 = vcmp.gt.f32.partialorder %v4613_v19, 0.0 }
  0xbc   : > { %v4633_v58 = vpop.xlane.xlu1 %401  ;;  %v4638_v62 = vpop.eup %4253  ;;  %v555_v4 = vmul.f32 %v539_v51, %v4470_v7  ;;  %v1320_v54 = vrot.slane %v539_v51, %v4583_v57  ;;  %v540_v11 = vsel %vm508_vm12, %v4252_v49, 0.0  ;;  %4265 = vrsqrt.f32 %v4631_v56  ;;  %3836 = vmatmul.mubr.msk.f32.vlgmr.msra.gmra.mrb[0].mxu1 %vm366_vm0, %v570_v48 }
  0xbd   : > { %v4646_v55 = vpop.eup %4255  ;;  %v1324_v9 = vrot.slane %v540_v11, %v4603_v12  ;;  %3829 = vmatmul.mubr.msk.f32.vlgmr.msra.gmra.mrb[0].mxu0 %vm366_vm0, %v568_v6  ;;  %4267 = vrsqrt.f32 %v4633_v58  ;;  %4084 = vmatpush3.bf16.xpose.msk.msra.mxu1 %vm4539_vm1, %v4547_v44  ;;  %v556_v3 = vmul.f32 %v540_v11, %v4473_v8  ;;  %vm512_vm3 = vcmp.gt.f32.partialorder %v4615_v27, 0.0 }
  0xbe   : > { %v4258_v53 = vpop.eup %4257  ;;  %v571_v7 = vmul.f32 %v555_v4, %v4607_v16  ;;  %4078 = vmatpush3.bf16.xpose.msk.msra.mxu0 %vm4539_vm1, %v4535_v41  ;;  %4093 = vmatprep.subr.msk.bf16.mxu1 %vm4539_vm1, %v4591_v61  ;;  %4269 = vrcp.f32 %v4641_v63  ;;  %vm513_vm5 = vcmp.gt.f32.partialorder %v4631_v56, 0.0  ;;  %vm514_vm7 = vcmp.gt.f32.partialorder %v4633_v58, 0.0 }
  0xbf   : > { %v4260_v38 = vpop.eup %4259  ;;  %v541_v20 = vsel %vm509_vm13, %v4258_v53, 0.0  ;;  %v4666_v24 = vpop.xlane.xlu0 %404  ;;  %4087 = vmatprep.subr.msk.bf16.mxu0 %vm4539_vm1, %v4587_v60  ;;  %v4677_v41 = vsel %vm1306_vm9, %v1324_v9, %v1320_v54  ;;  %v572_v32 = vmul.f32 %v556_v3, %v4607_v16  ;;  %v501_v39 = vsel %vm477_vm6, %v4646_v55, 0.0 }
  0xc0   : > { %v4668_v5 = vpop.xlane.xlu1 %407  ;;  %v557_v8 = vmul.f32 %v541_v20, %v4482_v13  ;;  %v1329_v44 = vrot.slane %v541_v20, %v4583_v57  ;;  %v542_v10 = vsel %vm510_vm15, %v4260_v38, 0.0  ;;  %3842 = vmatprep.mubr.msk.f32.mxu0 %vm366_vm0, %v571_v7  ;;  %4271 = vrsqrt.f32 %v4666_v24 }
  0xc1   : > { %v558_v23 = vmul.f32 %v542_v10, %v4485_v14  ;;  %v1333_v26 = vrot.slane %v542_v10, %v4603_v12  ;;  %4273 = vrsqrt.f32 %v4668_v5  ;;  %vm515_vm8 = vcmp.gt.f32.partialorder %v4666_v24, 0.0 }
  0xc2   : > { %v573_v13 = vmul.f32 %v557_v8, %v498_v17  ;;  %v4262_v1 = vpop.eup %4261  ;;  %vm478_vm10 = vcmp.gt.f32.partialorder %v4641_v63, 0.0  ;;  %vm516_vm11 = vcmp.gt.f32.partialorder %v4668_v5, 0.0  ;;  %vm1371_vm14 = vcmask 1041409  }
  0xc3   : > { %v574_v33 = vmul.f32 %v558_v23, %v498_v17  ;;  %v4699_v14 = vpop.xlane.xlu0 %410  ;;  %v4704_v0 = vsel %vm1306_vm9, %v1333_v26, %v1329_v44  ;;  %v4264_v40 = vpop.eup %4263  ;;  %v543_v45 = vsel %vm511_vm2, %v4262_v1, 0.0  ;;  %v355_v1 = vld [vmem:[%s4784_s24 + $0x28] sm:$0xff]  ;;  %vm1372_vm15 = vcmask 1042434  }
  0xc4   : > { %v4701_v36 = vpop.xlane.xlu1 %413  ;;  %4275 = vrsqrt.f32 %v4699_v14  ;;  %3849 = vmatprep.mubr.msk.f32.mxu1 %vm366_vm0, %v573_v13  ;;  %v559_v43 = vmul.f32 %v543_v45, %v4488_v15  ;;  %v1338_v16 = vrot.slane %v543_v45, %v4583_v57  ;;  %v544_v19 = vsel %vm512_vm3, %v4264_v40, 0.0  ;;  %v358_v40 = vld [vmem:[%s4784_s24 + $0x40] sm:$0xff] }
  0xc5   : > { %3843 = vmatmul.mubr.msk.f32.vlgmr.msra.gmra.mrb[2].mxu0 %vm366_vm0, %v572_v32  ;;  %4277 = vrsqrt.f32 %v4701_v36  ;;  %3850 = vmatmul.mubr.msk.f32.vlgmr.msra.gmra.mrb[2].mxu1 %vm366_vm0, %v574_v33  ;;  %v1342_v37 = vrot.slane %v544_v19, %v4603_v12  ;;  %v560_v46 = vmul.f32 %v544_v19, %v4491_v18  ;;  %vm517_vm12 = vcmp.gt.f32.partialorder %v4699_v14, 0.0  ;;  %v356_v33 = vld [vmem:[%s4784_s24 + $0x30] sm:$0xff]  ;;  %v357_v14 = vld [vmem:[%s4784_s24 + $0x38] sm:$0xff] }
  0xc6   : > { %4090 = vmatpush3.bf16.xpose.msk.msra.mxu0 %vm4539_vm1, %v4587_v60  ;;  %4096 = vmatpush3.bf16.xpose.msk.msra.mxu1 %vm4539_vm1, %v4591_v61  ;;  %v4266_v15 = vpop.eup %4265  ;;  %v575_v27 = vmul.f32 %v559_v43, %v499_v31  ;;  %v500_v61 = vsel %vm476_vm4, %v4638_v62, 0.0  ;;  %vm518_vm13 = vcmp.gt.f32.partialorder %v4701_v36, 0.0  ;;  %v4121_v36 = vpack.c.bf16 %v357_v14, %v356_v33  ;;  %v360_v19 = vld [vmem:[%s4784_s24 + $0x50] sm:$0xff] }
  0xc7   : > { %4099 = vmatprep.subr.msk.bf16.mxu0 %vm4539_vm1, %v4685_v25  ;;  %4105 = vmatprep.subr.msk.bf16.mxu1 %vm4539_vm1, %v4692_v28  ;;  %v4268_v60 = vpop.eup %4267  ;;  %v545_v47 = vsel %vm513_vm5, %v4266_v15, 0.0  ;;  %v4736_v18 = vsel %vm1306_vm9, %v1342_v37, %v1338_v16  ;;  %v576_v4 = vmul.f32 %v560_v46, %v499_v31  ;;  %v354_v31 = vld [vmem:[%s4784_s24 + $0x20] sm:$0xff]  ;;  %v359_v16 = vld [vmem:[%s4784_s24 + $0x48] sm:$0xff]  ;;  %v361_v37 = vld [vmem:[%s4784_s24 + $0x58] sm:$0xff]  ;;  %vm1374_vm2 = vcmask 1043459  }
  0xc8   : > { %v561_v52 = vmul.f32 %v545_v47, %v4498_v21  ;;  %v1347_v48 = vrot.slane %v545_v47, %v4583_v57  ;;  %v546_v49 = vsel %vm514_vm7, %v4268_v60, 0.0  ;;  %3856 = vmatprep.mubr.msk.f32.mxu0 %vm366_vm0, %v575_v27  ;;  %v4270_v51 = vpop.eup %4269  ;;  %v4117_v32 = vpack.c.bf16 %v355_v1, %v354_v31 }
  0xc9   : > { %v562_v6 = vmul.f32 %v546_v49, %v4501_v22  ;;  %v1351_v56 = vrot.slane %v546_v49, %v4603_v12  ;;  %v502_v7 = vsel %vm478_vm10, %v4270_v51, 0.0  ;;  %v4125_v49 = vpack.c.bf16 %v359_v16, %v358_v40 }
  0xca   : > { %v4272_v62 = vpop.eup %4271  ;;  %v577_v58 = vmul.f32 %v561_v52, %v500_v61  ;;  %v4129_v51 = vpack.c.bf16 %v361_v37, %v360_v19  ;;  %vm1376_vm3 = vcmask 1044484   ;;  %vm1378_vm4 = vcmask 1045509  }
  0xcb   : > { %v4274_v21 = vpop.eup %4273  ;;  %v578_v54 = vmul.f32 %v562_v6, %v500_v61  ;;  %v547_v11 = vsel %vm515_vm8, %v4272_v62, 0.0  ;;  %v4748_v9 = vsel %vm1306_vm9, %v1351_v56, %v1347_v48  ;;  %vm1380_vm5 = vcmask 1046534  }
  0xcc   : > { %v563_v22 = vmul.f32 %v547_v11, %v4512_v29  ;;  %v1356_v17 = vrot.slane %v547_v11, %v4583_v57  ;;  %v548_v55 = vsel %vm516_vm11, %v4274_v21, 0.0  ;;  %3863 = vmatprep.mubr.msk.f32.mxu1 %vm366_vm0, %v577_v58  ;;  %v363_v58 = vld [vmem:[%s4784_s24 + $0x68] sm:$0xff]  ;;  %v364_v21 = vld [vmem:[%s4784_s24 + $0x70] sm:$0xff]  ;;  %vm1382_vm6 = vcmask 1047559  }
  0xcd   : > { %3857 = vmatmul.mubr.msk.f32.vlgmr.msra.gmra.mrb[4].mxu0 %vm366_vm0, %v576_v4  ;;  %v1360_v63 = vrot.slane %v548_v55, %v4603_v12  ;;  %3864 = vmatmul.mubr.msk.f32.vlgmr.msra.gmra.mrb[4].mxu1 %vm366_vm0, %v578_v54  ;;  %v564_v3 = vmul.f32 %v548_v55, %v4515_v30  ;;  %v365_v54 = vld [vmem:[%s4784_s24 + $0x78] sm:$0xff] }
  0xce   : > { %v4276_v53 = vpop.eup %4275  ;;  %4102 = vmatpush3.bf16.xpose.msk.msra.mxu0 %vm4539_vm1, %v4685_v25  ;;  %v579_v38 = vmul.f32 %v563_v22, %v501_v39  ;;  %4108 = vmatpush3.bf16.xpose.msk.msra.mxu1 %vm4539_vm1, %v4692_v28  ;;  %v353_v28 = vld [vmem:[%s4784_s24 + $0x18] sm:$0xff]  ;;  %vm2099_vm1 = vcmask 64512  }
  0xcf   : > { %v4278_v29 = vpop.eup %4277  ;;  %v549_v20 = vsel %vm517_vm12, %v4276_v53, 0.0  ;;  %v4771_v30 = vsel %vm1306_vm9, %v1360_v63, %v1356_v17  ;;  %v580_v23 = vmul.f32 %v564_v3, %v501_v39  ;;  %v362_v39 = vld [vmem:[%s4784_s24 + $0x60] sm:$0xff] }
  0xd0   : > { %v565_v24 = vmul.f32 %v549_v20, %v4522_v34  ;;  %v1365_v5 = vrot.slane %v549_v20, %v4583_v57  ;;  %v550_v8 = vsel %vm518_vm13, %v4278_v29, 0.0  ;;  %3870 = vmatprep.mubr.msk.f32.mxu0 %vm366_vm0, %v579_v38  ;;  %v350_v34 = vld [vmem:[%s4784_s24] sm:$0xff]  ;;  %v352_v57 = vld [vmem:[%s4784_s24 + $0x10] sm:$0xff]  ;;  %v4133_v20 = vpack.c.bf16 %v363_v58, %v362_v39 }
  0xd1   : > { %v566_v44 = vmul.f32 %v550_v8, %v4525_v35  ;;  %v1369_v10 = vrot.slane %v550_v8, %v4603_v12  ;;  %v351_v35 = vld [vmem:[%s4784_s24 + $0x8] sm:$0xff]  ;;  %v4113_v13 = vpack.c.bf16 %v353_v28, %v352_v57  ;;  %s3574_s24 = sshll.u32 %s317_s21, 3 }
  0xd2   : > { %v581_v25 = vmul.f32 %v565_v24, %v502_v7  ;;  %v4109_v12 = vpack.c.bf16 %v351_v35, %v350_v34  ;;  %v4137_v24 = vpack.c.bf16 %v365_v54, %v364_v21  ;;  %s319_s26 = scalar_lea.vmem [#allocation2], %s3574_s24 }
  0xd3   : > { %v582_v26 = vmul.f32 %v566_v44, %v502_v7  ;;  %v4774_v42 = vsel %vm1306_vm9, %v1369_v10, %v1365_v5  ;;  %4114 = vmatprep.subr.bf16.mxu1 %v4113_v13  ;;  %vm2936_vm9 = vcmask 261120   ;;  %s3499_s10 = sshll.u32 %s319_s26, 4  ;;  %s5078_s10 = int_to_ptr.vmem [resolvable:$true] %s3499_s10 }
  0xd4   : > { %3877 = vmatprep.mubr.msk.f32.mxu1 %vm366_vm0, %v581_v25  ;;  %4110 = vmatprep.subr.bf16.mxu0 %v4109_v12  ;;  %s4279_s19 = scalar_lea.vmem %s5078_s10, 128  ;;  %p4286_p0 = scmp.lt.s32.totalorder %s5078_s10, %s4284_s20 }
  0xd5   : > { %3871 = vmatmul.mubr.msk.f32.vlgmr.msra.gmra.mrb[6].mxu0 %vm366_vm0, %v580_v23  ;;  %3878 = vmatmul.mubr.msk.f32.vlgmr.msra.gmra.mrb[6].mxu1 %vm366_vm0, %v582_v26  ;;  %p4280_p11 = scmp.ne.s32.totalorder %s5078_s10, %s4279_s19  ;;  %p4287_p1 = scmp.lt.s32.totalorder %s4285_s22, %s4279_s19 }
  0xd6   : > { %4112 = vmatpush3.bf16.msra.mxu0 %v4109_v12  ;;  %4116 = vmatpush3.bf16.msra.mxu1 %v4113_v13 }
  0xd7   : > { %4118 = vmatprep.subr.bf16.mxu0 %v4117_v32  ;;  %4122 = vmatprep.subr.bf16.mxu1 %v4121_v36  ;;  %p4281_p12 = pnand %p4280_p11, %p4430_p5  ;;  %p4288_p2 = por %p4287_p1, %p4286_p0 }
  0xd9   : > { %p4282_p13 = pneg %p4281_p12 }
  0xdb   : > { %p4289_p3 = pnand %p4288_p2, %p4282_p13 }
 0x18f   : > { %v3837_v43 = vpop.f32.mrb[0].mxu1 }
 0x190   : > { %v3830_v45 = vpop.f32.mrb[0].mxu0  ;;  %v4802_v27 = vmul.f32 %v3837_v43, %v4627_v2  ;;  %v748_v60 = vpop.f32.mrb[1].mxu1 }
 0x191   : > { %v4799_v15 = vmul.f32 %v3830_v45, %v4636_v59  ;;  %v661_v46 = vpop.f32.mrb[1].mxu0  ;;  %v4808_v47 = vmul.f32 %v4627_v2, %v748_v60 }
 0x192   : > { %v4805_v61 = vmul.f32 %v4636_v59, %v661_v46  ;;  %v3179_v48 = vsel %vm366_vm0, %v4802_v27, 0.0 }
 0x193   : > { %v3170_v52 = vsel %vm366_vm0, %v4799_v15, 0.0  ;;  %v3178_v59 = vsel %vm366_vm0, %v4808_v47, 0.0  ;;  %3891 = vmatprep.mubr.msk.f32.mxu1 %vm366_vm0, %v4808_v47 }
 0x194   : > { %v3169_v6 = vsel %vm366_vm0, %v4805_v61, 0.0  ;;  %3884 = vmatprep.mubr.msk.f32.mxu0 %vm366_vm0, %v4805_v61  ;;  %v3180_v56 = vadd.f32 %v3179_v48, %v3178_v59  ;;  %3892 = vmatmul.mubr.msk.f32.vlgmr.msra.gmra.mrb[8].mxu1 %vm366_vm0, %v4802_v27 }
 0x195   : > { %v3171_v2 = vadd.f32 %v3170_v52, %v3169_v6  ;;  %3885 = vmatmul.mubr.msk.f32.vlgmr.msra.gmra.mrb[8].mxu0 %vm366_vm0, %v4799_v15  ;;  %4124 = vmatpush3.bf16.msra.mxu1 %v4121_v36 }
 0x196   : > { %4120 = vmatpush3.bf16.msra.mxu0 %v4117_v32  ;;  %4130 = vmatprep.subr.bf16.mxu1 %v4129_v51  ;;  %v3181_v4 = vrot.slane %v3180_v56, 4 }
 0x197   : > { %4126 = vmatprep.subr.bf16.mxu0 %v4125_v49  ;;  %v3172_v62 = vrot.slane %v3171_v2, 4 }
 0x198   : > { %v3844_v11 = vpop.f32.mrb[2].mxu0  ;;  %v3851_v22 = vpop.f32.mrb[2].mxu1  ;;  %v3182_v29 = vadd.f32 %v3181_v4, %v3180_v56 }
 0x199   : > { %v4831_v17 = vmul.f32 %v3844_v11, %v4677_v41  ;;  %v835_v55 = vpop.f32.mrb[3].mxu0  ;;  %v4834_v53 = vmul.f32 %v3851_v22, %v4704_v0  ;;  %v922_v63 = vpop.f32.mrb[3].mxu1  ;;  %v3173_v7 = vadd.f32 %v3172_v62, %v3171_v2 }
 0x19a   : > { %v4837_v38 = vmul.f32 %v4677_v41, %v835_v55  ;;  %v4840_v3 = vmul.f32 %v4704_v0, %v922_v63  ;;  %v3183_v10 = vrot.slane %v3182_v29, 2 }
 0x19b   : > { %v3188_v5 = vsel %vm366_vm0, %v4831_v17, 0.0  ;;  %v3197_v8 = vsel %vm366_vm0, %v4834_v53, 0.0  ;;  %v3174_v44 = vrot.slane %v3173_v7, 2 }
 0x19c   : > { %v3187_v25 = vsel %vm366_vm0, %v4837_v38, 0.0  ;;  %v3196_v41 = vsel %vm366_vm0, %v4840_v3, 0.0  ;;  %3898 = vmatprep.mubr.msk.f32.mxu0 %vm366_vm0, %v4837_v38  ;;  %3905 = vmatprep.mubr.msk.f32.mxu1 %vm366_vm0, %v4840_v3  ;;  %v3184_v34 = vadd.f32 %v3183_v10, %v3182_v29 }
 0x19d   : > { %v3189_v0 = vadd.f32 %v3188_v5, %v3187_v25  ;;  %v3198_v23 = vadd.f32 %v3197_v8, %v3196_v41  ;;  %3899 = vmatmul.mubr.msk.f32.vlgmr.msra.gmra.mrb[10].mxu0 %vm366_vm0, %v4831_v17  ;;  %3906 = vmatmul.mubr.msk.f32.vlgmr.msra.gmra.mrb[10].mxu1 %vm366_vm0, %v4834_v53  ;;  %v3175_v26 = vadd.f32 %v3174_v44, %v3173_v7 }
 0x19e   : > { %4128 = vmatpush3.bf16.msra.mxu0 %v4125_v49  ;;  %4132 = vmatpush3.bf16.msra.mxu1 %v4129_v51  ;;  %v3185_v13 = vrot.slane %v3184_v34, 1 }
 0x19f   : > { %v3176_v35 = vrot.slane %v3175_v26, 1  ;;  %4134 = vmatprep.subr.bf16.mxu0 %v4133_v20  ;;  %4138 = vmatprep.subr.bf16.mxu1 %v4137_v24  ;;  %v3190_v57 = vrot.slane %v3189_v0, 4  ;;  %v3199_v12 = vrot.slane %v3198_v23, 4 }
 0x1a0   : > { %v3858_v28 = vpop.f32.mrb[4].mxu0  ;;  %v3865_v32 = vpop.f32.mrb[4].mxu1  ;;  %v3186_v52 = vadd.f32 %v3185_v13, %v3184_v34 }
 0x1a1   : > { %v4859_v31 = vmul.f32 %v3858_v28, %v4736_v18  ;;  %v1009_v1 = vpop.f32.mrb[5].mxu0  ;;  %v3177_v33 = vadd.f32 %v3176_v35, %v3175_v26  ;;  %v3191_v14 = vadd.f32 %v3190_v57, %v3189_v0  ;;  %v3200_v36 = vadd.f32 %v3199_v12, %v3198_v23  ;;  %v1096_v43 = vpop.f32.mrb[5].mxu1 }
 0x1a2   : > { %v4862_v40 = vmul.f32 %v4736_v18, %v1009_v1  ;;  %v4865_v45 = vmul.f32 %v3865_v32, %v4748_v9  ;;  %v4870_v19 = vmul.f32 %v4748_v9, %v1096_v43 }
 0x1a3   : > { %v3206_v16 = vsel %vm366_vm0, %v4859_v31, 0.0  ;;  %3246 = vbcast.lane.b32.xlu1 %v3177_v33, 264  ;;  %3242 = vbcast.lane.b32.xlu0 %v3177_v33, 256  ;;  %v3192_v37 = vrot.slane %v3191_v14, 2  ;;  %v3201_v46 = vrot.slane %v3200_v36, 2 }
 0x1a4   : > { %v3205_v60 = vsel %vm366_vm0, %v4862_v40, 0.0  ;;  %v3215_v18 = vsel %vm366_vm0, %v4865_v45, 0.0  ;;  %3912 = vmatprep.mubr.msk.f32.mxu0 %vm366_vm0, %v4862_v40  ;;  %v3214_v49 = vsel %vm366_vm0, %v4870_v19, 0.0  ;;  %3919 = vmatprep.mubr.msk.f32.mxu1 %vm366_vm0, %v4870_v19 }
 0x1a5   : > { %v3207_v48 = vadd.f32 %v3206_v16, %v3205_v60  ;;  %3913 = vmatmul.mubr.msk.f32.vlgmr.msra.gmra.mrb[12].mxu0 %vm366_vm0, %v4859_v31  ;;  %v3193_v9 = vadd.f32 %v3192_v37, %v3191_v14  ;;  %v3202_v51 = vadd.f32 %v3201_v46, %v3200_v36  ;;  %v3216_v6 = vadd.f32 %v3215_v18, %v3214_v49  ;;  %v2098_v46 = vld [vmem:[%s5120_s2] sm:$0xff] }
 0x1a6   : > { %3920 = vmatmul.mubr.msk.f32.vlgmr.msra.gmra.mrb[12].mxu1 %vm366_vm0, %v4865_v45  ;;  %4136 = vmatpush3.bf16.msra.mxu0 %v4133_v20 }
 0x1a7   : > { %3249 = vbcast.lane.b32.xlu1 %v3186_v52, 256  ;;  %v3194_v59 = vrot.slane %v3193_v9, 1  ;;  %4140 = vmatpush3.bf16.msra.mxu1 %v4137_v24  ;;  %v3208_v2 = vrot.slane %v3207_v48, 4  ;;  %v3217_v39 = vrot.slane %v3216_v6, 4  ;;  %v3203_v54 = vrot.slane %v3202_v51, 1 }
 0x1a8   : > { %v3872_v56 = vpop.f32.mrb[6].mxu0  ;;  %v3879_v58 = vpop.f32.mrb[6].mxu1  ;;  %3936 = vmatprep.subr.mxu0 %v2098_v46  ;;  %4187 = vmatprep.subr.mxu1 %v2098_v46 }
 0x1a9   : > { %v4887_v62 = vmul.f32 %v3872_v56, %v4771_v30  ;;  %v1183_v4 = vpop.f32.mrb[7].mxu0  ;;  %v3195_v21 = vadd.f32 %v3194_v59, %v3193_v9  ;;  %v3209_v11 = vadd.f32 %v3208_v2, %v3207_v48  ;;  %v4893_v55 = vmul.f32 %v3879_v58, %v4774_v42  ;;  %v1270_v63 = vpop.f32.mrb[7].mxu1 }
 0x1aa   : > { %v4890_v22 = vmul.f32 %v4771_v30, %v1183_v4  ;;  %v3218_v7 = vadd.f32 %v3217_v39, %v3216_v6  ;;  %v4898_v20 = vmul.f32 %v4774_v42, %v1270_v63  ;;  %v3204_v42 = vadd.f32 %v3203_v54, %v3202_v51  ;;  %v2933_v63 = vld [vmem:[%s5122_s4 + $0x8] sm:$0xff] }
 0x1ab   : > { %v3224_v29 = vsel %vm366_vm0, %v4887_v62, 0.0  ;;  %3256 = vbcast.lane.b32.xlu0 %v3195_v21, 256  ;;  %3253 = vbcast.lane.b32.xlu1 %v3186_v52, 264  ;;  %v3210_v24 = vrot.slane %v3209_v11, 2  ;;  %v3233_v30 = vsel %vm366_vm0, %v4893_v55, 0.0 }
 0x1ac   : > { %v3223_v5 = vsel %vm366_vm0, %v4890_v22, 0.0  ;;  %3926 = vmatprep.mubr.msk.f32.mxu0 %vm366_vm0, %v4890_v22  ;;  %v3219_v8 = vrot.slane %v3218_v7, 2  ;;  %v3232_v10 = vsel %vm366_vm0, %v4898_v20, 0.0  ;;  %3933 = vmatprep.mubr.msk.f32.mxu1 %vm366_vm0, %v4898_v20 }
 0x1ad   : > { %v3225_v44 = vadd.f32 %v3224_v29, %v3223_v5  ;;  %3927 = vmatmul.mubr.msk.f32.vlgmr.msra.gmra.mrb[14].mxu0 %vm366_vm0, %v4887_v62  ;;  %v3211_v25 = vadd.f32 %v3210_v24, %v3209_v11  ;;  %v3234_v41 = vadd.f32 %v3233_v30, %v3232_v10  ;;  %3934 = vmatmul.mubr.msk.f32.vlgmr.msra.gmra.mrb[14].mxu1 %vm366_vm0, %v4893_v55  ;;  %v2932_v11 = vld [vmem:[%s5122_s4] sm:$0xff]  ;;  %v2935_v24 = vld [vmem:[%s5122_s4 + $0x18] sm:$0xff] }
 0x1ae   : > { %v3220_v0 = vadd.f32 %v3219_v8, %v3218_v7  ;;  %3937 = vmatpush3.msra.mxu0 %v2098_v46  ;;  %4188 = vmatpush3.msra.mxu1 %v2098_v46  ;;  %v2934_v7 = vld [vmem:[%s5122_s4 + $0x10] sm:$0xff]  ;;  %v4173_v29 = vpack.c.bf16 %v2933_v63, %v2932_v11 }
 0x1af   : > { %3263 = vbcast.lane.b32.xlu0 %v3204_v42, 256  ;;  %3260 = vbcast.lane.b32.xlu1 %v3195_v21, 264  ;;  %v3212_v23 = vrot.slane %v3211_v25, 1  ;;  %v3226_v26 = vrot.slane %v3225_v44, 4  ;;  %v3235_v34 = vrot.slane %v3234_v41, 4  ;;  %v4177_v5 = vpack.c.bf16 %v2935_v24, %v2934_v7 }
 0x1b0   : > { %v3221_v57 = vrot.slane %v3220_v0, 1  ;;  %4174 = vmatprep.subr.bf16.mxu0 %v4173_v29 }
 0x1b1   : > { %v3213_v35 = vadd.f32 %v3212_v23, %v3211_v25  ;;  %v3227_v12 = vadd.f32 %v3226_v26, %v3225_v44  ;;  %v3236_v28 = vadd.f32 %v3235_v34, %v3234_v41 }
 0x1b2   : > { %v3222_v32 = vadd.f32 %v3221_v57, %v3220_v0 }
 0x1b3   : > { %3270 = vbcast.lane.b32.xlu0 %v3213_v35, 256  ;;  %3267 = vbcast.lane.b32.xlu1 %v3204_v42, 264  ;;  %v3228_v13 = vrot.slane %v3227_v12, 2  ;;  %v3237_v1 = vrot.slane %v3236_v28, 2 }
 0x1b5   : > { %v3229_v33 = vadd.f32 %v3228_v13, %v3227_v12  ;;  %v3238_v14 = vadd.f32 %v3237_v1, %v3236_v28 }
 0x1b7   : > { %3277 = vbcast.lane.b32.xlu0 %v3222_v32, 256  ;;  %3274 = vbcast.lane.b32.xlu1 %v3213_v35, 264  ;;  %v3230_v36 = vrot.slane %v3229_v33, 1  ;;  %v3239_v16 = vrot.slane %v3238_v14, 1 }
 0x1b9   : > { %v3231_v43 = vadd.f32 %v3230_v36, %v3229_v33  ;;  %v3240_v37 = vadd.f32 %v3239_v16, %v3238_v14 }
 0x1bb   : > { %3284 = vbcast.lane.b32.xlu0 %v3231_v43, 256  ;;  %3281 = vbcast.lane.b32.xlu1 %v3222_v32, 264 }
 0x1bf   : > { %3291 = vbcast.lane.b32.xlu0 %v3240_v37, 256  ;;  %3288 = vbcast.lane.b32.xlu1 %v3231_v43, 264 }
 0x1c3   : > { %3295 = vbcast.lane.b32.xlu1 %v3240_v37, 264 }
 0x267   : > { %v3893_v18 = vpop.f32.mrb[8].mxu1 }
 0x268   : > { %v3886_v60 = vpop.f32.mrb[8].mxu0  ;;  %v1603_v48 = vpop.f32.mrb[9].mxu1 }
 0x269   : > { %v1522_v52 = vpop.f32.mrb[9].mxu0 }
 0x26a   : > { %3938 = vmatprep.mubr.msk.f32.mxu0 %vm2099_vm1, %v1522_v52 }
 0x26b   : > { %3939 = vmatmul.mubr.msk.f32.vlgmr.msra.gmra.mrb[16].mxu0 %vm2099_vm1, %v3886_v60 }
 0x26c   : > { %3941 = vmatprep.mubr.msk.f32.mxu0 %vm2099_vm1, %v1603_v48  ;;  %4176 = vmatpush3.bf16.msra.mxu0 %v4173_v29 }
 0x26d   : > { %4178 = vmatprep.subr.bf16.mxu0 %v4177_v5 }
 0x26f   : > { %3942 = vmatmul.mubr.msk.f32.gmra.mrb[18].mxu0 %vm2099_vm1, %v3893_v18 }
 0x270   : > { %v3900_v49 = vpop.f32.mrb[10].mxu0  ;;  %v3907_v9 = vpop.f32.mrb[10].mxu1  ;;  %4180 = vmatpush3.bf16.msra.mxu0 %v4177_v5 }
 0x271   : > { %v1684_v51 = vpop.f32.mrb[11].mxu0  ;;  %v1765_v6 = vpop.f32.mrb[11].mxu1 }
 0x272   : > { %3944 = vmatprep.mubr.msk.f32.mxu0 %vm2099_vm1, %v1684_v51 }
 0x273   : > { %3945 = vmatmul.mubr.msk.f32.gmra.mrb[20].mxu0 %vm2099_vm1, %v3900_v49 }
 0x274   : > { %3947 = vmatprep.mubr.msk.f32.mxu0 %vm2099_vm1, %v1765_v6 }
 0x277   : > { %3948 = vmatmul.mubr.msk.f32.gmra.mrb[22].mxu0 %vm2099_vm1, %v3907_v9 }
 0x278   : > { %v3914_v59 = vpop.f32.mrb[12].mxu0 }
 0x279   : > { %v1846_v2 = vpop.f32.mrb[13].mxu0  ;;  %v3921_v56 = vpop.f32.mrb[12].mxu1 }
 0x27a   : > { %3950 = vmatprep.mubr.msk.f32.mxu0 %vm2099_vm1, %v1846_v2  ;;  %v1927_v39 = vpop.f32.mrb[13].mxu1 }
 0x27b   : > { %3951 = vmatmul.mubr.msk.f32.gmra.mrb[24].mxu0 %vm2099_vm1, %v3914_v59  ;;  %3953 = vmatprep.mubr.msk.f32.mxu1 %vm2099_vm1, %v1927_v39 }
 0x27c   : > { %3954 = vmatmul.mubr.msk.f32.vlgmr.msra.gmra.mrb[16].mxu1 %vm2099_vm1, %v3921_v56 }
 0x280   : > { %v3928_v4 = vpop.f32.mrb[14].mxu0  ;;  %v3935_v21 = vpop.f32.mrb[14].mxu1 }
 0x281   : > { %v2008_v58 = vpop.f32.mrb[15].mxu0  ;;  %v2089_v54 = vpop.f32.mrb[15].mxu1 }
 0x282   : > { %3956 = vmatprep.mubr.msk.f32.mxu1 %vm2099_vm1, %v2008_v58 }
 0x283   : > { %3957 = vmatmul.mubr.msk.f32.gmra.mrb[18].mxu1 %vm2099_vm1, %v3928_v4 }
 0x284   : > { %3959 = vmatprep.mubr.msk.f32.mxu1 %vm2099_vm1, %v2089_v54 }
 0x287   : > { %3960 = vmatmul.mubr.msk.f32.gmra.mrb[20].mxu1 %vm2099_vm1, %v3935_v21 }
 0x288   : > { %3966 = vmatprep.mubr.msk.f32.mxu1 %vm366_vm0, %v4805_v61  ;;  %v4950_v61 = vld [vmem:[%s5121_s3] ss:$0 sm:$0xff] }
 0x33e   : > { %v3940_v30 = vpop.f32.mrb[16].mxu0 }
 0x33f   : > { %v2301_v8 = vadd.f32 %v3940_v30, %v4950_v61  ;;  %v2214_v44 = vpop.f32.mrb[17].mxu0 }
 0x340   : > { %v2300_v10 = vadd.f32 %v4950_v61, %v2214_v44 }
 0x341   : > { %v2317_v42 = vmax.f32 %v2301_v8, 0.0 }
 0x342   : > { %v2316_v25 = vmax.f32 %v2300_v10, 0.0  ;;  %v3943_v41 = vpop.f32.mrb[18].mxu0 }
 0x343   : > { %v2303_v0 = vadd.f32 %v3943_v41, %v4950_v61  ;;  %v2224_v23 = vpop.f32.mrb[19].mxu0 }
 0x344   : > { %v4141_v26 = vpack.c.bf16 %v2317_v42, %v2316_v25  ;;  %v2302_v34 = vadd.f32 %v4950_v61, %v2224_v23 }
 0x345   : > { %v2319_v35 = vmax.f32 %v2303_v0, 0.0 }
 0x346   : > { %v2318_v57 = vmax.f32 %v2302_v34, 0.0  ;;  %v3946_v12 = vpop.f32.mrb[20].mxu0  ;;  %4142 = vmatprep.subr.bf16.mxu1 %v4141_v26  ;;  %v3386_v34 = vld [vmem:[%s5124_s6 + $0x8] sm:$0xff] }
 0x347   : > { %v2305_v28 = vadd.f32 %v3946_v12, %v4950_v61  ;;  %v2234_v13 = vpop.f32.mrb[21].mxu0  ;;  %4144 = vmatpush3.bf16.msra.mxu1 %v4141_v26  ;;  %v3385_v26 = vld [vmem:[%s5124_s6] sm:$0xff]  ;;  %v3387_v12 = vld [vmem:[%s5124_s6 + $0x10] sm:$0xff] }
 0x348   : > { %v4145_v1 = vpack.c.bf16 %v2319_v35, %v2318_v57  ;;  %v2304_v32 = vadd.f32 %v4950_v61, %v2234_v13  ;;  %v4182_v35 = vpack.c.bf16 %v3386_v34, %v3385_v26  ;;  %v4343_v57 = vmov 0.0|0.0  }
 0x349   : > { %v2321_v33 = vmax.f32 %v2305_v28, 0.0  ;;  %v3388_v28 = vld [vmem:[%s5124_s6 + $0x18] sm:$0xff] }
 0x34a   : > { %v2320_v14 = vmax.f32 %v2304_v32, 0.0  ;;  %v3949_v36 = vpop.f32.mrb[22].mxu0  ;;  %3967 = vmatmul.mubr.msk.f32.vlgmr.msra.gmra.mrb[22].mxu1 %vm366_vm0, %v4799_v15  ;;  %4146 = vmatprep.subr.bf16.mxu1 %v4145_v1  ;;  %v4185_v13 = vpack.c.bf16 %v3388_v28, %v3387_v12  ;;  %v3247_v32 = vpop.permute.xlu1 %3246 }
 0x34b   : > { %v2307_v43 = vadd.f32 %v3949_v36, %v4950_v61  ;;  %v2244_v16 = vpop.f32.mrb[23].mxu0  ;;  %4148 = vmatpush3.bf16.msra.mxu1 %v4145_v1  ;;  %3973 = vmatprep.mubr.msk.f32.mxu1 %vm366_vm0, %v4808_v47  ;;  %v4345_v1 = vmov 0.0   ;;  %v3243_v36 = vpop.permute.xlu0 %3242 }
 0x34c   : > { %v4149_v37 = vpack.c.bf16 %v2321_v33, %v2320_v14  ;;  %v2306_v46 = vadd.f32 %v4950_v61, %v2244_v16 }
 0x34d   : > { %v2323_v60 = vmax.f32 %v2307_v43, 0.0  ;;  %v5029_v43 = vld [vmem:[%s5123_s5] ss:$0 sm:$0xff] }
 0x34e   : > { %v2322_v18 = vmax.f32 %v2306_v46, 0.0  ;;  %v3952_v52 = vpop.f32.mrb[24].mxu0  ;;  %3974 = vmatmul.mubr.msk.f32.vlgmr.msra.gmra.mrb[24].mxu1 %vm366_vm0, %v4802_v27  ;;  %4150 = vmatprep.subr.bf16.mxu1 %v4149_v37  ;;  %v3250_v33 = vpop.permute.xlu1 %3249 }
 0x34f   : > { %v2309_v15 = vadd.f32 %v3952_v52, %v4950_v61  ;;  %v2254_v48 = vpop.f32.mrb[25].mxu0  ;;  %v3955_v49 = vpop.f32.mrb[16].mxu1  ;;  %4152 = vmatpush3.bf16.msra.mxu1 %v4149_v37  ;;  %3980 = vmatprep.mubr.msk.f32.mxu1 %vm366_vm0, %v4837_v38 }
 0x350   : > { %v4153_v9 = vpack.c.bf16 %v2323_v60, %v2322_v18  ;;  %v2308_v47 = vadd.f32 %v4950_v61, %v2254_v48  ;;  %v2311_v51 = vadd.f32 %v3955_v49, %v4950_v61  ;;  %v2264_v6 = vpop.f32.mrb[17].mxu1  ;;  %v3257_v60 = vpop.permute.xlu0 %3256 }
 0x351   : > { %v2325_v59 = vmax.f32 %v2309_v15, 0.0  ;;  %v2310_v2 = vadd.f32 %v4950_v61, %v2264_v6 }
 0x352   : > { %v2324_v56 = vmax.f32 %v2308_v47, 0.0  ;;  %v2327_v27 = vmax.f32 %v2311_v51, 0.0  ;;  %3981 = vmatmul.mubr.msk.f32.vlgmr.msra.gmra.mrb[26].mxu1 %vm366_vm0, %v4831_v17  ;;  %4154 = vmatprep.subr.bf16.mxu1 %v4153_v9  ;;  %v3254_v14 = vpop.permute.xlu1 %3253 }
 0x353   : > { %v2326_v39 = vmax.f32 %v2310_v2, 0.0  ;;  %4156 = vmatpush3.bf16.msra.mxu1 %v4153_v9  ;;  %3987 = vmatprep.mubr.msk.f32.mxu1 %vm366_vm0, %v4840_v3 }
 0x354   : > { %v4157_v38 = vpack.c.bf16 %v2325_v59, %v2324_v56 }
 0x355   : > { %v4161_v4 = vpack.c.bf16 %v2327_v27, %v2326_v39  ;;  %v3264_v27 = vpop.permute.xlu0 %3263 }
 0x356   : > { %v3958_v58 = vpop.f32.mrb[18].mxu1  ;;  %3988 = vmatmul.mubr.msk.f32.vlgmr.msra.gmra.mrb[28].mxu1 %vm366_vm0, %v4834_v53  ;;  %4158 = vmatprep.subr.bf16.mxu1 %v4157_v38  ;;  %v3261_v52 = vpop.permute.xlu1 %3260 }
 0x357   : > { %v2313_v21 = vadd.f32 %v3958_v58, %v4950_v61  ;;  %v2274_v54 = vpop.f32.mrb[19].mxu1  ;;  %4160 = vmatpush3.bf16.msra.mxu1 %v4157_v38  ;;  %3994 = vmatprep.mubr.msk.f32.mxu1 %vm366_vm0, %v4862_v40 }
 0x358   : > { %v2312_v17 = vadd.f32 %v4950_v61, %v2274_v54  ;;  %4162 = vmatprep.subr.bf16.mxu1 %v4161_v4 }
 0x359   : > { %v2329_v11 = vmax.f32 %v2313_v21, 0.0 }
 0x35a   : > { %v2328_v63 = vmax.f32 %v2312_v17, 0.0  ;;  %v3961_v3 = vpop.f32.mrb[20].mxu1  ;;  %3995 = vmatmul.mubr.msk.f32.vlgmr.msra.gmra.mrb[30].mxu1 %vm366_vm0, %v4859_v31  ;;  %v3268_v58 = vpop.permute.xlu1 %3267 }
 0x35b   : > { %v2315_v7 = vadd.f32 %v3961_v3, %v4950_v61  ;;  %v2284_v53 = vpop.f32.mrb[21].mxu1  ;;  %4164 = vmatpush3.bf16.msra.mxu1 %v4161_v4  ;;  %4001 = vmatprep.mubr.msk.f32.mxu1 %vm366_vm0, %v4870_v19 }
 0x35c   : > { %v4165_v29 = vpack.c.bf16 %v2329_v11, %v2328_v63  ;;  %v2314_v24 = vadd.f32 %v4950_v61, %v2284_v53 }
 0x35d   : > { %v2331_v40 = vmax.f32 %v2315_v7, 0.0 }
 0x35e   : > { %v2330_v5 = vmax.f32 %v2314_v24, 0.0  ;;  %4166 = vmatprep.subr.bf16.mxu1 %v4165_v29  ;;  %4002 = vmatmul.mubr.msk.f32.vlgmr.msra.gmra.mrb[32].mxu1 %vm366_vm0, %v4865_v45 }
 0x35f   : > { %4168 = vmatpush3.bf16.msra.mxu1 %v4165_v29  ;;  %4008 = vmatprep.mubr.msk.f32.mxu1 %vm366_vm0, %v4890_v22 }
 0x360   : > { %v4169_v31 = vpack.c.bf16 %v2331_v40, %v2330_v5 }
 0x362   : > { %4170 = vmatprep.subr.bf16.mxu1 %v4169_v31  ;;  %4009 = vmatmul.mubr.msk.f32.vlgmr.msra.gmra.mrb[34].mxu1 %vm366_vm0, %v4887_v62 }
 0x363   : > { %4172 = vmatpush3.bf16.msra.mxu1 %v4169_v31  ;;  %4015 = vmatprep.mubr.msk.f32.mxu1 %vm366_vm0, %v4898_v20 }
 0x364   : > { %4181 = vmatprep.subr.bf16.mxu1 %v4343_v57 }
 0x366   : > { %4016 = vmatmul.mubr.msk.f32.vlgmr.msra.gmra.mrb[36].mxu1 %vm366_vm0, %v4893_v55  ;;  %vm4344_vm0 = vmmov 0  }
 0x367   : > { %4183 = vmatpush3.bf16.msra.mxu1 %v4182_v35  ;;  %4058 = vmatprep.mubr.msk.f32.mxu1 %vm4344_vm0, %v4345_v1 }
 0x368   : > { %4184 = vmatprep.subr.bf16.mxu1 %v4343_v57 }
 0x36b   : > { %4186 = vmatpush3.bf16.msra.mxu1 %v4185_v13 }
 0x41d   : > { %v3968_v19 = vpop.f32.mrb[22].mxu1 }
 0x41e   : > { %v2398_v61 = vpop.f32.mrb[23].mxu1 }
 0x41f   : > { %4026 = vmatprep.mubr.msk.f32.mxu0 %vm2936_vm9, %v2398_v61 }
 0x420   : > { %4027 = vmatmul.mubr.msk.f32.vlgmr.msra.gmra.mrb[26].mxu0 %vm2936_vm9, %v3968_v19 }
 0x421   : > { %v3975_v45 = vpop.f32.mrb[24].mxu1 }
 0x422   : > { %v2473_v22 = vpop.f32.mrb[25].mxu1 }
 0x423   : > { %4029 = vmatprep.mubr.msk.f32.mxu0 %vm2936_vm9, %v2473_v22 }
 0x424   : > { %4030 = vmatmul.mubr.msk.f32.gmra.mrb[28].mxu0 %vm2936_vm9, %v3975_v45 }
 0x425   : > { %v3982_v62 = vpop.f32.mrb[26].mxu1 }
 0x426   : > { %v2548_v30 = vpop.f32.mrb[27].mxu1 }
 0x427   : > { %4032 = vmatprep.mubr.msk.f32.mxu0 %vm2936_vm9, %v2548_v30 }
 0x428   : > { %4033 = vmatmul.mubr.msk.f32.gmra.mrb[30].mxu0 %vm2936_vm9, %v3982_v62  ;;  %v3271_v62 = vpop.permute.xlu0 %3270 }
 0x429   : > { %v3989_v55 = vpop.f32.mrb[28].mxu1 }
 0x42a   : > { %v2623_v20 = vpop.f32.mrb[29].mxu1 }
 0x42b   : > { %4035 = vmatprep.mubr.msk.f32.mxu0 %vm2936_vm9, %v2623_v20  ;;  %v3275_v20 = vpop.permute.xlu1 %3274 }
 0x42c   : > { %4036 = vmatmul.mubr.msk.f32.gmra.mrb[32].mxu0 %vm2936_vm9, %v3989_v55 }
 0x42d   : > { %v3996_v8 = vpop.f32.mrb[30].mxu1 }
 0x42e   : > { %v2698_v44 = vpop.f32.mrb[31].mxu1 }
 0x42f   : > { %4038 = vmatprep.mubr.msk.f32.mxu0 %vm2936_vm9, %v2698_v44 }
 0x430   : > { %4039 = vmatmul.mubr.msk.f32.gmra.mrb[34].mxu0 %vm2936_vm9, %v3996_v8 }
 0x431   : > { %v4003_v10 = vpop.f32.mrb[32].mxu1 }
 0x432   : > { %v2773_v42 = vpop.f32.mrb[33].mxu1 }
 0x433   : > { %4041 = vmatprep.mubr.msk.f32.mxu0 %vm2936_vm9, %v2773_v42 }
 0x434   : > { %4042 = vmatmul.mubr.msk.f32.gmra.mrb[36].mxu0 %vm2936_vm9, %v4003_v10 }
 0x435   : > { %v4010_v25 = vpop.f32.mrb[34].mxu1 }
 0x436   : > { %v2848_v41 = vpop.f32.mrb[35].mxu1 }
 0x437   : > { %4044 = vmatprep.mubr.msk.f32.mxu0 %vm2936_vm9, %v2848_v41 }
 0x438   : > { %4045 = vmatmul.mubr.msk.f32.gmra.mrb[38].mxu0 %vm2936_vm9, %v4010_v25 }
 0x439   : > { %v4017_v0 = vpop.f32.mrb[36].mxu1 }
 0x43a   : > { %v2923_v23 = vpop.f32.mrb[37].mxu1 }
 0x43b   : > { %4047 = vmatprep.mubr.msk.f32.mxu0 %vm2936_vm9, %v2923_v23 }
 0x43c   : > { %4048 = vmatmul.mubr.msk.f32.gmra.mrb[40].mxu0 %vm2936_vm9, %v4017_v0 }
 0x4f3   : > { %v4028_v16 = vpop.f32.mrb[26].mxu0 }
 0x4f4   : > { %v3138_v37 = vadd.f32 %v4028_v16, %v5029_v43  ;;  %v3051_v46 = vpop.f32.mrb[27].mxu0 }
 0x4f5   : > { %v3137_v18 = vadd.f32 %v5029_v43, %v3051_v46 }
 0x4f6   : > { %v3154_v15 = vmax.f32 %v3138_v37, 0.0 }
 0x4f7   : > { %v3153_v48 = vmax.f32 %v3137_v18, 0.0  ;;  %v4031_v49 = vpop.f32.mrb[28].mxu0  ;;  %v3282_v18 = vpop.permute.xlu1 %3281 }
 0x4f8   : > { %v3298_v9 = vmul.f32 %v3247_v32, %v3154_v15  ;;  %v3140_v47 = vadd.f32 %v4031_v49, %v5029_v43  ;;  %v3061_v51 = vpop.f32.mrb[29].mxu0 }
 0x4f9   : > { %v3297_v6 = vmul.f32 %v3243_v36, %v3153_v48  ;;  %v3139_v59 = vadd.f32 %v5029_v43, %v3061_v51  ;;  %v3278_v36 = vpop.permute.xlu0 %3277 }
 0x4fa   : > { %v3314_v2 = vsel %vm2936_vm9, %v3298_v9, 0.0  ;;  %v3156_v56 = vmax.f32 %v3140_v47, 0.0 }
 0x4fb   : > { %v3313_v39 = vsel %vm2936_vm9, %v3297_v6, 0.0  ;;  %v3155_v38 = vmax.f32 %v3139_v59, 0.0  ;;  %v4034_v4 = vpop.f32.mrb[30].mxu0 }
 0x4fc   : > { %v3315_v21 = vadd.f32 %v3314_v2, %v3313_v39  ;;  %v3300_v54 = vmul.f32 %v3254_v14, %v3156_v56  ;;  %v3142_v17 = vadd.f32 %v4034_v4, %v5029_v43  ;;  %v3071_v11 = vpop.f32.mrb[31].mxu0 }
 0x4fd   : > { %v3299_v63 = vmul.f32 %v3250_v33, %v3155_v38  ;;  %v3141_v3 = vadd.f32 %v5029_v43, %v3071_v11 }
 0x4fe   : > { %v3316_v7 = vrot.slane %v3315_v21, 4  ;;  %v3323_v53 = vsel %vm2936_vm9, %v3300_v54, 0.0  ;;  %v3158_v29 = vmax.f32 %v3142_v17, 0.0 }
 0x4ff   : > { %v3322_v24 = vsel %vm2936_vm9, %v3299_v63, 0.0  ;;  %v3157_v40 = vmax.f32 %v3141_v3, 0.0  ;;  %v4037_v5 = vpop.f32.mrb[32].mxu0 }
 0x500   : > { %v3317_v31 = vadd.f32 %v3316_v7, %v3315_v21  ;;  %v3324_v19 = vadd.f32 %v3323_v53, %v3322_v24  ;;  %v3302_v61 = vmul.f32 %v3261_v52, %v3158_v29  ;;  %v3144_v45 = vadd.f32 %v4037_v5, %v5029_v43  ;;  %v3081_v22 = vpop.f32.mrb[33].mxu0  ;;  %v3289_v5 = vpop.permute.xlu1 %3288 }
 0x501   : > { %v3301_v30 = vmul.f32 %v3257_v60, %v3157_v40  ;;  %v3143_v55 = vadd.f32 %v5029_v43, %v3081_v22  ;;  %v3285_v40 = vpop.permute.xlu0 %3284 }
 0x502   : > { %v3318_v8 = vrot.slane %v3317_v31, 2  ;;  %v3325_v44 = vrot.slane %v3324_v19, 4  ;;  %v3332_v10 = vsel %vm2936_vm9, %v3302_v61, 0.0  ;;  %v3160_v42 = vmax.f32 %v3144_v45, 0.0 }
 0x503   : > { %v3331_v25 = vsel %vm2936_vm9, %v3301_v30, 0.0  ;;  %v3159_v41 = vmax.f32 %v3143_v55, 0.0  ;;  %v4040_v0 = vpop.f32.mrb[34].mxu0 }
 0x504   : > { %v3319_v23 = vadd.f32 %v3318_v8, %v3317_v31  ;;  %v3326_v26 = vadd.f32 %v3325_v44, %v3324_v19  ;;  %v3333_v34 = vadd.f32 %v3332_v10, %v3331_v25  ;;  %v3304_v35 = vmul.f32 %v3268_v58, %v3160_v42  ;;  %v3091_v57 = vpop.f32.mrb[35].mxu0 }
 0x505   : > { %v3303_v12 = vmul.f32 %v3264_v27, %v3159_v41  ;;  %v3146_v28 = vadd.f32 %v4040_v0, %v5029_v43  ;;  %v3145_v13 = vadd.f32 %v5029_v43, %v3091_v57 }
 0x506   : > { %v3320_v1 = vrot.slane %v3319_v23, 1  ;;  %v3327_v32 = vrot.slane %v3326_v26, 2  ;;  %v3334_v33 = vrot.slane %v3333_v34, 4  ;;  %v3341_v14 = vsel %vm2936_vm9, %v3304_v35, 0.0 }
 0x507   : > { %v3340_v16 = vsel %vm2936_vm9, %v3303_v12, 0.0  ;;  %v3162_v37 = vmax.f32 %v3146_v28, 0.0  ;;  %v3161_v46 = vmax.f32 %v3145_v13, 0.0  ;;  %v4043_v60 = vpop.f32.mrb[36].mxu0 }
 0x508   : > { %v3328_v52 = vadd.f32 %v3327_v32, %v3326_v26  ;;  %v3335_v15 = vadd.f32 %v3334_v33, %v3333_v34  ;;  %v3342_v48 = vadd.f32 %v3341_v14, %v3340_v16  ;;  %v3101_v49 = vpop.f32.mrb[37].mxu0  ;;  %v3148_v51 = vadd.f32 %v4043_v60, %v5029_v43  ;;  %v3292_v33 = vpop.permute.xlu0 %3291 }
 0x509   : > { %v3306_v9 = vmul.f32 %v3275_v20, %v3162_v37  ;;  %v3305_v47 = vmul.f32 %v3271_v62, %v3161_v46  ;;  %v3147_v6 = vadd.f32 %v5029_v43, %v3101_v49  ;;  %v3321_v59 = vadd.f32 %v3320_v1, %v3319_v23  ;;  %v3296_v14 = vpop.permute.xlu1 %3295 }
 0x50a   : > { %v3329_v2 = vrot.slane %v3328_v52, 1  ;;  %v3336_v56 = vrot.slane %v3335_v15, 2  ;;  %v3343_v27 = vrot.slane %v3342_v48, 4  ;;  %v3164_v4 = vmax.f32 %v3148_v51, 0.0 }
 0x50b   : > { %v3350_v39 = vsel %vm2936_vm9, %v3306_v9, 0.0  ;;  %v3349_v38 = vsel %vm2936_vm9, %v3305_v47, 0.0  ;;  %v3163_v58 = vmax.f32 %v3147_v6, 0.0  ;;  %v4046_v21 = vpop.f32.mrb[38].mxu0 }
 0x50c   : > { %v3330_v54 = vadd.f32 %v3329_v2, %v3328_v52  ;;  %v3337_v17 = vadd.f32 %v3336_v56, %v3335_v15  ;;  %v3344_v11 = vadd.f32 %v3343_v27, %v3342_v48  ;;  %v3351_v63 = vadd.f32 %v3350_v39, %v3349_v38  ;;  %v3111_v3 = vpop.f32.mrb[39].mxu0 }
 0x50d   : > { %v3308_v7 = vmul.f32 %v3282_v18, %v3164_v4  ;;  %v3307_v53 = vmul.f32 %v3278_v36, %v3163_v58  ;;  %v3150_v29 = vadd.f32 %v4046_v21, %v5029_v43  ;;  %v3149_v24 = vadd.f32 %v5029_v43, %v3111_v3 }
 0x50e   : > { %v3405_v31 = vsel %vm1371_vm14, %v3330_v54, %v3321_v59  ;;  %v3338_v19 = vrot.slane %v3337_v17, 1  ;;  %v3345_v61 = vrot.slane %v3344_v11, 2  ;;  %v3352_v45 = vrot.slane %v3351_v63, 4 }
 0x50f   : > { %v3359_v22 = vsel %vm2936_vm9, %v3308_v7, 0.0  ;;  %v3358_v62 = vsel %vm2936_vm9, %v3307_v53, 0.0  ;;  %v3166_v30 = vmax.f32 %v3150_v29, 0.0  ;;  %v3165_v55 = vmax.f32 %v3149_v24, 0.0  ;;  %v4049_v20 = vpop.f32.mrb[40].mxu0 }
 0x510   : > { %v3339_v8 = vadd.f32 %v3338_v19, %v3337_v17  ;;  %v3346_v44 = vadd.f32 %v3345_v61, %v3344_v11  ;;  %v3353_v10 = vadd.f32 %v3352_v45, %v3351_v63  ;;  %v3360_v42 = vadd.f32 %v3359_v22, %v3358_v62  ;;  %v3121_v25 = vpop.f32.mrb[41].mxu0  ;;  %v3389_v24 = vld [vmem:[%s5125_s7] sm:$0x1] }
 0x511   : > { %v3310_v41 = vmul.f32 %v3289_v5, %v3166_v30  ;;  %v3309_v0 = vmul.f32 %v3285_v40, %v3165_v55  ;;  %v3152_v23 = vadd.f32 %v4049_v20, %v5029_v43  ;;  %v3151_v26 = vadd.f32 %v5029_v43, %v3121_v25 }
 0x512   : > { %v3406_v34 = vsel %vm1372_vm15, %v3339_v8, %v3405_v31  ;;  %v3347_v35 = vrot.slane %v3346_v44, 1  ;;  %v3354_v57 = vrot.slane %v3353_v10, 2  ;;  %v3361_v12 = vrot.slane %v3360_v42, 4 }
 0x513   : > { %v3368_v28 = vsel %vm2936_vm9, %v3310_v41, 0.0  ;;  %v3367_v13 = vsel %vm2936_vm9, %v3309_v0, 0.0  ;;  %v3168_v1 = vmax.f32 %v3152_v23, 0.0  ;;  %v3167_v32 = vmax.f32 %v3151_v26, 0.0 }
 0x514   : > { %v3348_v36 = vadd.f32 %v3347_v35, %v3346_v44  ;;  %v3355_v16 = vadd.f32 %v3354_v57, %v3353_v10  ;;  %v3362_v37 = vadd.f32 %v3361_v12, %v3360_v42  ;;  %v3369_v46 = vadd.f32 %v3368_v28, %v3367_v13 }
 0x515   : > { %v3312_v60 = vmul.f32 %v3296_v14, %v3168_v1  ;;  %v3311_v18 = vmul.f32 %v3292_v33, %v3167_v32  ;;  %v3390_v40 = vmul.f32 16.0, %v3389_v24  ;;  %v3394_v5 = vsub.s32 0, %v4570_v50 }
 0x516   : > { %v3356_v43 = vrot.slane %v3355_v16, 1  ;;  %v3363_v52 = vrot.slane %v3362_v37, 2  ;;  %v3370_v15 = vrot.slane %v3369_v46, 4  ;;  %v3407_v48 = vsel %vm1374_vm2, %v3348_v36, %v3406_v34 }
 0x517   : > { %v3377_v49 = vsel %vm2936_vm9, %v3312_v60, 0.0  ;;  %v3376_v9 = vsel %vm2936_vm9, %v3311_v18, 0.0  ;;  %v3395_v31 = vrot.slane %v3390_v40, %v3394_v5 }
 0x518   : > { %v3357_v47 = vadd.f32 %v3356_v43, %v3355_v16  ;;  %v3364_v51 = vadd.f32 %v3363_v52, %v3362_v37  ;;  %v3371_v6 = vadd.f32 %v3370_v15, %v3369_v46  ;;  %v3378_v59 = vadd.f32 %v3377_v49, %v3376_v9 }
 0x51a   : > { %v3365_v2 = vrot.slane %v3364_v51, 1  ;;  %v3372_v56 = vrot.slane %v3371_v6, 2  ;;  %v3379_v27 = vrot.slane %v3378_v59, 4  ;;  %v3408_v39 = vsel %vm1376_vm3, %v3357_v47, %v3407_v48 }
 0x51c   : > { %v3366_v38 = vadd.f32 %v3365_v2, %v3364_v51  ;;  %v3373_v4 = vadd.f32 %v3372_v56, %v3371_v6  ;;  %v3380_v58 = vadd.f32 %v3379_v27, %v3378_v59 }
 0x51e   : > { %v3374_v21 = vrot.slane %v3373_v4, 1  ;;  %v3381_v54 = vrot.slane %v3380_v58, 2  ;;  %v3409_v17 = vsel %vm1378_vm4, %v3366_v38, %v3408_v39 }
 0x520   : > { %v3375_v11 = vadd.f32 %v3374_v21, %v3373_v4  ;;  %v3382_v63 = vadd.f32 %v3381_v54, %v3380_v58 }
 0x522   : > { %v3383_v3 = vrot.slane %v3382_v63, 1  ;;  %v3410_v7 = vsel %vm1380_vm5, %v3375_v11, %v3409_v17 }
 0x524   : > { %v3384_v53 = vadd.f32 %v3383_v3, %v3382_v63 }
 0x526   : > { %v3411_v29 = vsel %vm1382_vm6, %v3384_v53, %v3410_v7 }
 0x527   : > { %4059 = vmatmul.mubr.msk.f32.vlgmr.msra.gmra.mrb[38].mxu1 %vm2936_vm9, %v3411_v29 }
 0x5fa   : > { %v3480_v19 = vpop.f32.mrb[38].mxu1 }
 0x5fb   : > { %v3481_v61 = vadd.f32 %v3480_v19, %v3395_v31  ;;  %v4060_v45 = vpop.f32.mrb[39].mxu1 }
 0x5fd   : > { %3484 = vst [vmem:[%s319_s26] sm:$0xff] %v3481_v61 }
 0x5fe   : > { %4292 = shalt.err (!%p4289_p3)
}
 0x5ff   : > { %s4293_s21 = scalar_lea.hbm %s5076_s17, 128  ;;  %s4297_s25 = scalar_lea.hbm %s5126_s8, 256 }
 0x600   : > { %p4294_p4 = scmp.ne.s32.totalorder %s5076_s17, %s4293_s21  ;;  %p4298_p9 = scmp.lt.u32.totalorder %s5076_s17, %s5126_s8 }
 0x601   : > { %p4299_p10 = scmp.lt.u32.totalorder %s4297_s25, %s4293_s21  ;;  %p4301_p12 = scmp.lt.u32.totalorder %s4293_s21, %s5076_s17 }
 0x602   : > { %p4295_p7 = pnand %p4294_p4, %p4430_p5 }
 0x603   : > { %p4300_p11 = por %p4299_p10, %p4298_p9 }
 0x604   : > { %p4296_p8 = pneg %p4295_p7 }
 0x605   : > { %p4302_p13 = por %p4301_p12, %p4300_p11 }
 0x607   : > { %p4303_p0 = pnand %p4302_p13, %p4296_p8 }
 0x609   : > { %4306 = shalt.err (!%p4303_p0)
}
 0x60a   : > { %4189 = dma.vmem_to_hbm [thread:$0]  (%p4430_p5), %s5078_s10, 128, %s5076_s17, %s3486_s18  }
 0x60b PF: > { %p4195_p1 = scmp.ge.s32.totalorder %s4341_s30, 2  ;;  %s3511_s13 = sand.u32 1, %s4329_s27  }
 0x60c   : > { %s3512_s19 = scalar_lea.sflag [#allocation3], %s3511_s13 }
 0x60d   : > { %p4192_p2 = pnand %p4195_p1, %p4434_p6 }
 0x60f   : > { %4324 = dma.done.wait (!%p4192_p2), %s3512_s19, 128  }
 0x610   : > { %4326 = vsyncadd (!%p4192_p2), %s3512_s19, 4294967168  ;;  %p18_p3 = scmp.ge.s32.totalorder %s4417_s11, 4   ;;  %s5131_s27 = smov %s4333_s28 }
 0x611   : > { %s5132_s28 = smov %s4337_s29  ;;  %s5133_s29 = smov %s4428_s14 }
 0x612   : > { %s5134_s30 = smov %s4417_s11  ;;  %20 = sbr.rel (!%p18_p3) target bundleno = 3 (0x3), region = 90 }
 0x619   :  { %3517 = vsyncpa [#allocation3], 1 }
 0x61a   :  { %3519 = vsyncpa [#allocation3 + $0x1], 1 }

</bundles_post_ra>
